<compile_context>
chip_gen: v6e
topology: v6e:2x2x1
jax: 0.10.0
libtpu: 0.0.40
codegen_flags: <defaults>
</compile_context>

<pallas_src>
import math
from functools import partial

import jax
import jax.numpy as jnp
from jax.experimental import pallas as pl
from jax.experimental.pallas import tpu as pltpu


# ----------------------------------------------------------------------------
# Fused kernel: conv_1 -> relu -> bn_1 -> Res2 dilated convs -> conv_3 -> relu -> bn_3
#               -> + residual -> MaxPool1d -> AFMS.
# One grid step per batch element; everything for that element stays in VMEM.
# ----------------------------------------------------------------------------
def _res2_pool_afms_kernel(x_ref, w1_ref, b1_ref, s1_ref, t1_ref,
                           wd_ref, bd_ref, sd_ref, td_ref,
                           w3_ref, b3_ref, s3_ref, t3_ref,
                           wres_ref, sel_ref, alpha_ref, fcw_ref, fcb_ref,
                           o_ref, *, width, scale, ksize, dilation, pool, has_res_conv):
    f32 = jnp.float32
    bf16 = jnp.bfloat16
    nums = scale - 1
    T = x_ref.shape[-1]
    pad = (ksize // 2) * dilation

    x = x_ref[0]                                           # (C_in, T) f32
    x_bf = x.astype(bf16)

    # conv_1 (1x1) -> relu -> bn_1 (folded), f32 accumulation / elementwise
    h = jnp.dot(w1_ref[...], x_bf, preferred_element_type=f32) + b1_ref[...]
    h = jnp.maximum(h, 0.0)
    h = h * s1_ref[...] + t1_ref[...]                      # (width*scale, T)

    # time-index iota for zero-padding masks of the dilated convs
    t_idx = jax.lax.broadcasted_iota(jnp.int32, (width, T), 1)

    # Res2 dilated convs; conv_3 is accumulated per split so `cat` never materializes.
    out = None
    sp = None
    for i in range(nums):
        s_i = h[i * width:(i + 1) * width, :]
        sp = s_i if i == 0 else sp + s_i
        # build K shifted (zero-padded) copies via roll + mask, stack along contraction axis
        taps = []
        for j in range(ksize):
            off = j * dilation - pad                       # shifted[:, t] == sp[:, t + off]
            if off == 0:
                taps.append(sp)
            else:
                rolled = pltpu.roll(sp, shift=(-off) % T, axis=1)
                valid = (t_idx >= -off) & (t_idx < T - off)
                taps.append(jnp.where(valid, rolled, 0.0))
        stacked = jnp.concatenate(taps, axis=0).astype(bf16)        # (K*width, T)
        conv = jnp.dot(wd_ref[i], stacked, preferred_element_type=f32) + bd_ref[i]
        conv = jnp.maximum(conv, 0.0)                      # relu
        sp = conv * sd_ref[i] + td_ref[i]                  # folded bn (f32)
        # conv_3 contribution of this split
        term = jnp.dot(w3_ref[i], sp.astype(bf16), preferred_element_type=f32)
        out = term if out is None else out + term
    # untouched last split goes straight into conv_3
    last = h[nums * width: scale * width, :]
    out = out + jnp.dot(w3_ref[nums], last.astype(bf16), preferred_element_type=f32)

    # conv_3 bias -> relu -> bn_3 (folded)
    out = out + b3_ref[...]
    out = jnp.maximum(out, 0.0)
    out = out * s3_ref[...] + t3_ref[...]

    # residual: 1x1 conv only if in_channels != out_channels, else a free VPU add
    if has_res_conv:
        out = out + jnp.dot(wres_ref[...], x_bf, preferred_element_type=f32)
    else:
        out = out + x.astype(f32)

    # MaxPool1d(pool): window max via rolls (XLU), then stride-`pool` decimation as a
    # small 0/1 selection matmul (keeps lanes dense, no strided lane slices needed).
    if pool > 1:
        mx = out
        for j in range(1, pool):
            mx = jnp.maximum(mx, pltpu.roll(out, shift=(T - j) % T, axis=1))
        pooled = jnp.dot(mx, sel_ref[...], preferred_element_type=f32)   # (C_out, Tp)
    else:
        pooled = out

    # AFMS: time mean -> fc -> sigmoid gate; (x + alpha) * gate   (all f32)
    tp = pooled.shape[-1]
    mean = jnp.sum(pooled, axis=-1, keepdims=True) * (1.0 / tp)          # (C_out, 1)
    z = jnp.dot(fcw_ref[...], mean, preferred_element_type=f32) + fcb_ref[...]
    gate = 1.0 / (1.0 + jnp.exp(-z))
    o_ref[0] = ((pooled + alpha_ref[...]) * gate).astype(o_ref.dtype)


# ----------------------------------------------------------------------------
# Wrapper
# ----------------------------------------------------------------------------
def res2_maxpooling_block(x, params, *, kernel_size, dilation, scale, max_pooling_size):
    B, C_in, T = x.shape
    width = params["width"]
    C_out = params["w3"].shape[0]
    nums = scale - 1
    p = int(max_pooling_size) if max_pooling_size else 1
    Tp = T // p
    f32, bf16 = jnp.float32, jnp.bfloat16

    # bf16 matmul operands (accumulation stays f32 in-kernel)
    w1 = params["w1"].astype(bf16)                                          # (width*scale, C_in)
    # (nums, K, width, width) -> (nums, width, K*width): one fused matmul per split
    wd_stk = jnp.transpose(params["wd"], (0, 2, 1, 3)).reshape(
        nums, width, kernel_size * width).astype(bf16)
    # (C_out, width*scale) -> (scale, C_out, width): per-split conv_3 weight blocks
    w3s = params["w3"].reshape(C_out, scale, width).transpose(1, 0, 2).astype(bf16)
    has_res_conv = params["wres"] is not None
    wres = params["wres"].astype(bf16) if has_res_conv else jnp.zeros((1, 1), bf16)

    # 0/1 selection matrix implementing the stride-p decimation of the max pool
    if p > 1:
        tt = jax.lax.broadcasted_iota(jnp.int32, (T, Tp), 0)
        kk = jax.lax.broadcasted_iota(jnp.int32, (T, Tp), 1)
        sel = (tt == p * kk).astype(f32)
    else:
        sel = jnp.zeros((1, 1), f32)

    args = [x, w1, params["b1"], params["bn1_scale"], params["bn1_shift"],
            wd_stk, params["bd"], params["bnd_scale"], params["bnd_shift"],
            w3s, params["b3"], params["bn3_scale"], params["bn3_shift"],
            wres, sel, params["alpha"], params["fc_w"], params["fc_b"]]

    def full(a):
        return pl.BlockSpec(a.shape, lambda b, nd=a.ndim: (0,) * nd)

    in_specs = [pl.BlockSpec((1, C_in, T), lambda b: (b, 0, 0))]
    in_specs += [full(a) for a in args[1:]]

    flops = 2 * B * T * (width * scale * C_in                         # conv_1
                         + nums * width * kernel_size * width         # res2 dilated convs
                         + C_out * width * scale                      # conv_3
                         + (C_out * C_in if has_res_conv else 0))     # residual
    flops += 2 * B * (C_out * T * Tp + C_out * C_out)                 # pool-select + fc
    bytes_accessed = 4 * (int(x.size) + B * C_out * Tp) + sum(
        int(a.size) * a.dtype.itemsize for a in args[1:])

    # TODO(synk): for B=1 inference on v7x (2 TensorCores), add a second "parallel" grid
    # axis (e.g. time tiles with a conv halo) so both cores are occupied.
    return pl.pallas_call(
        partial(_res2_pool_afms_kernel, width=width, scale=scale, ksize=kernel_size,
                dilation=dilation, pool=p, has_res_conv=has_res_conv),
        out_shape=jax.ShapeDtypeStruct((B, C_out, Tp), jnp.float32),
        grid_spec=pltpu.PrefetchScalarGridSpec(
            num_scalar_prefetch=0,
            grid=(B,),
            in_specs=in_specs,
            out_specs=pl.BlockSpec((1, C_out, Tp), lambda b: (b, 0, 0)),
        ),
        compiler_params=pltpu.CompilerParams(dimension_semantics=("parallel",)),
        cost_estimate=pl.CostEstimate(flops=flops, transcendentals=B * C_out,
                                      bytes_accessed=bytes_accessed),
    )(*args)


# ----------------------------------------------------------------------------
# Deterministic parameter init (shapes follow Res2MaxPoolingBlock.__init__)
# ----------------------------------------------------------------------------
def init_params(key, in_channels, out_channels, kernel_size, scale):
    width = int(math.floor(out_channels / scale))
    c_mid = width * scale
    nums = scale - 1
    f32 = jnp.float32
    ks = iter(jax.random.split(key, 32))

    def rn(shape, s=0.1):
        return (jax.random.normal(next(ks), shape, f32) * s).astype(f32)

    def bn_fold(c):
        gamma = 1.0 + 0.1 * jax.random.normal(next(ks), (c, 1), f32)
        beta = 0.1 * jax.random.normal(next(ks), (c, 1), f32)
        mean = 0.1 * jax.random.normal(next(ks), (c, 1), f32)
        var = jax.random.uniform(next(ks), (c, 1), f32, minval=0.5, maxval=1.5)
        sc = gamma * jax.lax.rsqrt(var + 1e-5)
        return sc.astype(f32), (beta - mean * sc).astype(f32)

    params = {"width": width}
    params["w1"] = rn((c_mid, in_channels))
    params["b1"] = rn((c_mid, 1))
    params["bn1_scale"], params["bn1_shift"] = bn_fold(c_mid)
    params["wd"] = rn((nums, kernel_size, width, width))            # (split, tap, out, in)
    params["bd"] = rn((nums, width, 1))
    sds, tds = zip(*[bn_fold(width) for _ in range(nums)])
    params["bnd_scale"] = jnp.stack(sds, axis=0)
    params["bnd_shift"] = jnp.stack(tds, axis=0)
    params["w3"] = rn((out_channels, c_mid))
    params["b3"] = rn((out_channels, 1))
    params["bn3_scale"], params["bn3_shift"] = bn_fold(out_channels)
    # nn.Identity() residual when channels match -> no weight (kernel does a plain add)
    params["wres"] = rn((out_channels, in_channels)) if in_channels != out_channels else None
    params["alpha"] = jnp.ones((out_channels, 1), f32)              # AFMS.alpha init
    params["fc_w"] = rn((out_channels, out_channels))               # AFMS.fc weight (out, in)
    params["fc_b"] = rn((out_channels, 1))                          # AFMS.fc bias
    return params


# ----------------------------------------------------------------------------
# Pure-JAX f32 reference (same inference-mode BN semantics) for a correctness check
# ----------------------------------------------------------------------------
def reference(x, params, *, kernel_size, dilation, scale, max_pooling_size):
    width = params["width"]
    nums = scale - 1
    pad = (kernel_size // 2) * dilation
    B, C_in, T = x.shape

    h = jnp.einsum("oi,bit->bot", params["w1"], x) + params["b1"][None]
    h = jnp.maximum(h, 0.0)
    h = h * params["bn1_scale"][None] + params["bn1_shift"][None]
    splits = [h[:, g * width:(g + 1) * width, :] for g in range(scale)]

    pieces = []
    sp = None
    for i in range(nums):
        sp = splits[0] if i == 0 else sp + splits[i]
        xp = jnp.pad(sp, ((0, 0), (0, 0), (pad, pad)))
        c = None
        for j in range(kernel_size):
            t = jnp.einsum("oi,bit->bot", params["wd"][i, j],
                           xp[:, :, j * dilation:j * dilation + T])
            c = t if c is None else c + t
        c = c + params["bd"][i][None]
        c = jnp.maximum(c, 0.0)
        sp = c * params["bnd_scale"][i][None] + params["bnd_shift"][i][None]
        pieces.append(sp)
    pieces.append(splits[nums])
    cat = jnp.concatenate(pieces, axis=1)

    out = jnp.einsum("oi,bit->bot", params["w3"], cat) + params["b3"][None]
    out = jnp.maximum(out, 0.0)
    out = out * params["bn3_scale"][None] + params["bn3_shift"][None]
    res = (jnp.einsum("oi,bit->bot", params["wres"], x)
           if params["wres"] is not None else x)
    out = out + res

    p = max_pooling_size if max_pooling_size else 1
    Tp = T // p
    pooled = out[:, :, :Tp * p].reshape(B, -1, Tp, p).max(axis=-1)

    m = pooled.mean(axis=-1)                                        # (B, C)
    z = jax.nn.sigmoid(m @ params["fc_w"].T + params["fc_b"][:, 0][None, :])
    return (pooled + params["alpha"][None]) * z[:, :, None]


if __name__ == "__main__":
    B, C_in, T = 2, 16, 256          # T multiple of 128 -> lane-dense blocks
    C_out, K, DIL, SCALE, MPOOL = 32, 3, 2, 4, 2

    key = jax.random.PRNGKey(0)
    kx, kp = jax.random.split(key)
    x = jax.random.normal(kx, (B, C_in, T), jnp.float32)
    params = init_params(kp, C_in, C_out, K, SCALE)

    out = res2_maxpooling_block(x, params, kernel_size=K, dilation=DIL,
                                scale=SCALE, max_pooling_size=MPOOL)
    out = jax.block_until_ready(out)

    ref = reference(x, params, kernel_size=K, dilation=DIL,
                    scale=SCALE, max_pooling_size=MPOOL)

    assert out.shape == (B, C_out, T // MPOOL), out.shape
    err = jnp.abs(out - ref)
    max_err = float(jnp.max(err))
    mean_err = float(jnp.mean(err))
    # bf16 matmul operands (f32 accumulation) -> slightly looser tolerance than pure f32
    if not (max_err < 1.2e-1 and mean_err < 1.5e-2):
        raise AssertionError(f"mismatch vs reference: max_err={max_err} mean_err={mean_err}")
    print("KERNEL_OK")
</pallas_src>

<mosaic_0001>
module attributes {stable_mosaic.version = 11 : i64} {
  func.func @_res2_pool_afms_kernel(%arg0: i32, %arg1: memref<1x16x256xf32, #tpu.memory_space<vmem>>, %arg2: memref<32x16xbf16, #tpu.memory_space<vmem>>, %arg3: memref<32x1xf32, #tpu.memory_space<vmem>>, %arg4: memref<32x1xf32, #tpu.memory_space<vmem>>, %arg5: memref<32x1xf32, #tpu.memory_space<vmem>>, %arg6: memref<3x8x24xbf16, #tpu.memory_space<vmem>>, %arg7: memref<3x8x1xf32, #tpu.memory_space<vmem>>, %arg8: memref<3x8x1xf32, #tpu.memory_space<vmem>>, %arg9: memref<3x8x1xf32, #tpu.memory_space<vmem>>, %arg10: memref<4x32x8xbf16, #tpu.memory_space<vmem>>, %arg11: memref<32x1xf32, #tpu.memory_space<vmem>>, %arg12: memref<32x1xf32, #tpu.memory_space<vmem>>, %arg13: memref<32x1xf32, #tpu.memory_space<vmem>>, %arg14: memref<32x16xbf16, #tpu.memory_space<vmem>>, %arg15: memref<256x128xf32, #tpu.memory_space<vmem>>, %arg16: memref<32x1xf32, #tpu.memory_space<vmem>>, %arg17: memref<32x32xf32, #tpu.memory_space<vmem>>, %arg18: memref<32x1xf32, #tpu.memory_space<vmem>>, %arg19: memref<1x32x128xf32, #tpu.memory_space<vmem>>) attributes {dimension_semantics = [#tpu.dimension_semantics<parallel>], iteration_bounds = array<i64: 2>, scalar_prefetch = 0 : i64, scratch_operands = 0 : i64, tpu.core_type = #tpu.core_type<tc>, window_params = [{transform_indices = @transform_0, window_bounds = array<i64: 1, 16, 256>}, {pipeline_mode = #tpu.pipeline_mode<synchronous>, transform_indices = @transform_1, window_bounds = array<i64: 32, 16>}, {pipeline_mode = #tpu.pipeline_mode<synchronous>, transform_indices = @transform_2, window_bounds = array<i64: 32, 1>}, {pipeline_mode = #tpu.pipeline_mode<synchronous>, transform_indices = @transform_3, window_bounds = array<i64: 32, 1>}, {pipeline_mode = #tpu.pipeline_mode<synchronous>, transform_indices = @transform_4, window_bounds = array<i64: 32, 1>}, {pipeline_mode = #tpu.pipeline_mode<synchronous>, transform_indices = @transform_5, window_bounds = array<i64: 3, 8, 24>}, {pipeline_mode = #tpu.pipeline_mode<synchronous>, transform_indices = @transform_6, window_bounds = array<i64: 3, 8, 1>}, {pipeline_mode = #tpu.pipeline_mode<synchronous>, transform_indices = @transform_7, window_bounds = array<i64: 3, 8, 1>}, {pipeline_mode = #tpu.pipeline_mode<synchronous>, transform_indices = @transform_8, window_bounds = array<i64: 3, 8, 1>}, {pipeline_mode = #tpu.pipeline_mode<synchronous>, transform_indices = @transform_9, window_bounds = array<i64: 4, 32, 8>}, {pipeline_mode = #tpu.pipeline_mode<synchronous>, transform_indices = @transform_10, window_bounds = array<i64: 32, 1>}, {pipeline_mode = #tpu.pipeline_mode<synchronous>, transform_indices = @transform_11, window_bounds = array<i64: 32, 1>}, {pipeline_mode = #tpu.pipeline_mode<synchronous>, transform_indices = @transform_12, window_bounds = array<i64: 32, 1>}, {pipeline_mode = #tpu.pipeline_mode<synchronous>, transform_indices = @transform_13, window_bounds = array<i64: 32, 16>}, {pipeline_mode = #tpu.pipeline_mode<synchronous>, transform_indices = @transform_14, window_bounds = array<i64: 256, 128>}, {pipeline_mode = #tpu.pipeline_mode<synchronous>, transform_indices = @transform_15, window_bounds = array<i64: 32, 1>}, {pipeline_mode = #tpu.pipeline_mode<synchronous>, transform_indices = @transform_16, window_bounds = array<i64: 32, 32>}, {pipeline_mode = #tpu.pipeline_mode<synchronous>, transform_indices = @transform_17, window_bounds = array<i64: 32, 1>}, {transform_indices = @transform_18, window_bounds = array<i64: 1, 32, 128>}]} {
    %c0 = arith.constant 0 : index
    %c0_0 = arith.constant 0 : index
    %c0_1 = arith.constant 0 : index
    %0 = vector.load %arg1[%c0, %c0_0, %c0_1] : memref<1x16x256xf32, #tpu.memory_space<vmem>>, vector<1x16x256xf32>
    %1 = vector.shape_cast %0 : vector<1x16x256xf32> to vector<16x256xf32>
    %2 = arith.truncf %1 : vector<16x256xf32> to vector<16x256xbf16>
    %c0_2 = arith.constant 0 : index
    %c0_3 = arith.constant 0 : index
    %3 = vector.load %arg2[%c0_2, %c0_3] : memref<32x16xbf16, #tpu.memory_space<vmem>>, vector<32x16xbf16>
    %cst = arith.constant dense<0.000000e+00> : vector<32x256xf32>
    %4 = tpu.matmul %3, %2, %cst {dimension_numbers = #tpu.dot_dimension_numbers<[1], [0], [0], [1], [0, 0, 1, 1], [], []>} : vector<32x16xbf16>, vector<16x256xbf16>, vector<32x256xf32> -> vector<32x256xf32>
    %c0_4 = arith.constant 0 : index
    %c0_5 = arith.constant 0 : index
    %5 = vector.load %arg3[%c0_4, %c0_5] : memref<32x1xf32, #tpu.memory_space<vmem>>, vector<32x1xf32>
    %6 = vector.broadcast %5 : vector<32x1xf32> to vector<32x256xf32>
    %7 = arith.addf %4, %6 : vector<32x256xf32>
    %cst_6 = arith.constant 0.000000e+00 : f32
    %8 = vector.broadcast %cst_6 : f32 to vector<32x256xf32>
    %9 = arith.maximumf %7, %8 : vector<32x256xf32>
    %c0_7 = arith.constant 0 : index
    %c0_8 = arith.constant 0 : index
    %10 = vector.load %arg4[%c0_7, %c0_8] : memref<32x1xf32, #tpu.memory_space<vmem>>, vector<32x1xf32>
    %11 = vector.broadcast %10 : vector<32x1xf32> to vector<32x256xf32>
    %12 = arith.mulf %9, %11 : vector<32x256xf32>
    %c0_9 = arith.constant 0 : index
    %c0_10 = arith.constant 0 : index
    %13 = vector.load %arg5[%c0_9, %c0_10] : memref<32x1xf32, #tpu.memory_space<vmem>>, vector<32x1xf32>
    %14 = vector.broadcast %13 : vector<32x1xf32> to vector<32x256xf32>
    %15 = arith.addf %12, %14 : vector<32x256xf32>
    %16 = tpu.iota {dimensions = array<i32: 1>} : vector<8x256xi32>
    %17 = vector.extract_strided_slice %15 {offsets = [0, 0], sizes = [8, 256], strides = [1, 1]} : vector<32x256xf32> to vector<8x256xf32>
    %c2_i32 = arith.constant 2 : i32
    %18 = tpu.dynamic_rotate %17 by %c2_i32 dim 1 : vector<8x256xf32>, i32 -> vector<8x256xf32>
    %c2_i32_11 = arith.constant 2 : i32
    %19 = vector.broadcast %c2_i32_11 : i32 to vector<8x256xi32>
    %20 = arith.cmpi sge, %16, %19 : vector<8x256xi32>
    %c258_i32 = arith.constant 258 : i32
    %21 = vector.broadcast %c258_i32 : i32 to vector<8x256xi32>
    %22 = arith.cmpi slt, %16, %21 : vector<8x256xi32>
    %23 = arith.andi %20, %22 : vector<8x256xi1>
    %cst_12 = arith.constant 0.000000e+00 : f32
    %24 = vector.broadcast %cst_12 : f32 to vector<8x256xf32>
    %25 = arith.select %23, %18, %24 : vector<8x256xi1>, vector<8x256xf32>
    %c254_i32 = arith.constant 254 : i32
    %26 = tpu.dynamic_rotate %17 by %c254_i32 dim 1 : vector<8x256xf32>, i32 -> vector<8x256xf32>
    %c-2_i32 = arith.constant -2 : i32
    %27 = vector.broadcast %c-2_i32 : i32 to vector<8x256xi32>
    %28 = arith.cmpi sge, %16, %27 : vector<8x256xi32>
    %c254_i32_13 = arith.constant 254 : i32
    %29 = vector.broadcast %c254_i32_13 : i32 to vector<8x256xi32>
    %30 = arith.cmpi slt, %16, %29 : vector<8x256xi32>
    %31 = arith.andi %28, %30 : vector<8x256xi1>
    %cst_14 = arith.constant 0.000000e+00 : f32
    %32 = vector.broadcast %cst_14 : f32 to vector<8x256xf32>
    %33 = arith.select %31, %26, %32 : vector<8x256xi1>, vector<8x256xf32>
    %34 = tpu.concatenate %25, %17, %33 in 0 : vector<8x256xf32>, vector<8x256xf32>, vector<8x256xf32> -> vector<24x256xf32>
    %35 = arith.truncf %34 : vector<24x256xf32> to vector<24x256xbf16>
    %c0_15 = arith.constant 0 : index
    %c0_16 = arith.constant 0 : index
    %c0_17 = arith.constant 0 : index
    %36 = vector.load %arg6[%c0_15, %c0_16, %c0_17] : memref<3x8x24xbf16, #tpu.memory_space<vmem>>, vector<1x8x24xbf16>
    %37 = vector.shape_cast %36 : vector<1x8x24xbf16> to vector<8x24xbf16>
    %cst_18 = arith.constant dense<0.000000e+00> : vector<8x256xf32>
    %38 = tpu.matmul %37, %35, %cst_18 {dimension_numbers = #tpu.dot_dimension_numbers<[1], [0], [0], [1], [0, 0, 1, 1], [], []>} : vector<8x24xbf16>, vector<24x256xbf16>, vector<8x256xf32> -> vector<8x256xf32>
    %c0_19 = arith.constant 0 : index
    %c0_20 = arith.constant 0 : index
    %c0_21 = arith.constant 0 : index
    %39 = vector.load %arg7[%c0_19, %c0_20, %c0_21] : memref<3x8x1xf32, #tpu.memory_space<vmem>>, vector<1x8x1xf32>
    %40 = vector.shape_cast %39 : vector<1x8x1xf32> to vector<8x1xf32>
    %41 = vector.broadcast %40 : vector<8x1xf32> to vector<8x256xf32>
    %42 = arith.addf %38, %41 : vector<8x256xf32>
    %cst_22 = arith.constant 0.000000e+00 : f32
    %43 = vector.broadcast %cst_22 : f32 to vector<8x256xf32>
    %44 = arith.maximumf %42, %43 : vector<8x256xf32>
    %c0_23 = arith.constant 0 : index
    %c0_24 = arith.constant 0 : index
    %c0_25 = arith.constant 0 : index
    %45 = vector.load %arg8[%c0_23, %c0_24, %c0_25] : memref<3x8x1xf32, #tpu.memory_space<vmem>>, vector<1x8x1xf32>
    %46 = vector.shape_cast %45 : vector<1x8x1xf32> to vector<8x1xf32>
    %47 = vector.broadcast %46 : vector<8x1xf32> to vector<8x256xf32>
    %48 = arith.mulf %44, %47 : vector<8x256xf32>
    %c0_26 = arith.constant 0 : index
    %c0_27 = arith.constant 0 : index
    %c0_28 = arith.constant 0 : index
    %49 = vector.load %arg9[%c0_26, %c0_27, %c0_28] : memref<3x8x1xf32, #tpu.memory_space<vmem>>, vector<1x8x1xf32>
    %50 = vector.shape_cast %49 : vector<1x8x1xf32> to vector<8x1xf32>
    %51 = vector.broadcast %50 : vector<8x1xf32> to vector<8x256xf32>
    %52 = arith.addf %48, %51 : vector<8x256xf32>
    %c0_29 = arith.constant 0 : index
    %c0_30 = arith.constant 0 : index
    %c0_31 = arith.constant 0 : index
    %53 = vector.load %arg10[%c0_29, %c0_30, %c0_31] : memref<4x32x8xbf16, #tpu.memory_space<vmem>>, vector<1x32x8xbf16>
    %54 = vector.shape_cast %53 : vector<1x32x8xbf16> to vector<32x8xbf16>
    %55 = arith.truncf %52 : vector<8x256xf32> to vector<8x256xbf16>
    %cst_32 = arith.constant dense<0.000000e+00> : vector<32x256xf32>
    %56 = tpu.matmul %54, %55, %cst_32 {dimension_numbers = #tpu.dot_dimension_numbers<[1], [0], [0], [1], [0, 0, 1, 1], [], []>} : vector<32x8xbf16>, vector<8x256xbf16>, vector<32x256xf32> -> vector<32x256xf32>
    %57 = vector.extract_strided_slice %15 {offsets = [8, 0], sizes = [8, 256], strides = [1, 1]} : vector<32x256xf32> to vector<8x256xf32>
    %58 = arith.addf %52, %57 : vector<8x256xf32>
    %c2_i32_33 = arith.constant 2 : i32
    %59 = tpu.dynamic_rotate %58 by %c2_i32_33 dim 1 : vector<8x256xf32>, i32 -> vector<8x256xf32>
    %c2_i32_34 = arith.constant 2 : i32
    %60 = vector.broadcast %c2_i32_34 : i32 to vector<8x256xi32>
    %61 = arith.cmpi sge, %16, %60 : vector<8x256xi32>
    %c258_i32_35 = arith.constant 258 : i32
    %62 = vector.broadcast %c258_i32_35 : i32 to vector<8x256xi32>
    %63 = arith.cmpi slt, %16, %62 : vector<8x256xi32>
    %64 = arith.andi %61, %63 : vector<8x256xi1>
    %cst_36 = arith.constant 0.000000e+00 : f32
    %65 = vector.broadcast %cst_36 : f32 to vector<8x256xf32>
    %66 = arith.select %64, %59, %65 : vector<8x256xi1>, vector<8x256xf32>
    %c254_i32_37 = arith.constant 254 : i32
    %67 = tpu.dynamic_rotate %58 by %c254_i32_37 dim 1 : vector<8x256xf32>, i32 -> vector<8x256xf32>
    %c-2_i32_38 = arith.constant -2 : i32
    %68 = vector.broadcast %c-2_i32_38 : i32 to vector<8x256xi32>
    %69 = arith.cmpi sge, %16, %68 : vector<8x256xi32>
    %c254_i32_39 = arith.constant 254 : i32
    %70 = vector.broadcast %c254_i32_39 : i32 to vector<8x256xi32>
    %71 = arith.cmpi slt, %16, %70 : vector<8x256xi32>
    %72 = arith.andi %69, %71 : vector<8x256xi1>
    %cst_40 = arith.constant 0.000000e+00 : f32
    %73 = vector.broadcast %cst_40 : f32 to vector<8x256xf32>
    %74 = arith.select %72, %67, %73 : vector<8x256xi1>, vector<8x256xf32>
    %75 = tpu.concatenate %66, %58, %74 in 0 : vector<8x256xf32>, vector<8x256xf32>, vector<8x256xf32> -> vector<24x256xf32>
    %76 = arith.truncf %75 : vector<24x256xf32> to vector<24x256xbf16>
    %c1 = arith.constant 1 : index
    %c0_41 = arith.constant 0 : index
    %c0_42 = arith.constant 0 : index
    %77 = vector.load %arg6[%c1, %c0_41, %c0_42] : memref<3x8x24xbf16, #tpu.memory_space<vmem>>, vector<1x8x24xbf16>
    %78 = vector.shape_cast %77 : vector<1x8x24xbf16> to vector<8x24xbf16>
    %cst_43 = arith.constant dense<0.000000e+00> : vector<8x256xf32>
    %79 = tpu.matmul %78, %76, %cst_43 {dimension_numbers = #tpu.dot_dimension_numbers<[1], [0], [0], [1], [0, 0, 1, 1], [], []>} : vector<8x24xbf16>, vector<24x256xbf16>, vector<8x256xf32> -> vector<8x256xf32>
    %c1_44 = arith.constant 1 : index
    %c0_45 = arith.constant 0 : index
    %c0_46 = arith.constant 0 : index
    %80 = vector.load %arg7[%c1_44, %c0_45, %c0_46] : memref<3x8x1xf32, #tpu.memory_space<vmem>>, vector<1x8x1xf32>
    %81 = vector.shape_cast %80 : vector<1x8x1xf32> to vector<8x1xf32>
    %82 = vector.broadcast %81 : vector<8x1xf32> to vector<8x256xf32>
    %83 = arith.addf %79, %82 : vector<8x256xf32>
    %cst_47 = arith.constant 0.000000e+00 : f32
    %84 = vector.broadcast %cst_47 : f32 to vector<8x256xf32>
    %85 = arith.maximumf %83, %84 : vector<8x256xf32>
    %c1_48 = arith.constant 1 : index
    %c0_49 = arith.constant 0 : index
    %c0_50 = arith.constant 0 : index
    %86 = vector.load %arg8[%c1_48, %c0_49, %c0_50] : memref<3x8x1xf32, #tpu.memory_space<vmem>>, vector<1x8x1xf32>
    %87 = vector.shape_cast %86 : vector<1x8x1xf32> to vector<8x1xf32>
    %88 = vector.broadcast %87 : vector<8x1xf32> to vector<8x256xf32>
    %89 = arith.mulf %85, %88 : vector<8x256xf32>
    %c1_51 = arith.constant 1 : index
    %c0_52 = arith.constant 0 : index
    %c0_53 = arith.constant 0 : index
    %90 = vector.load %arg9[%c1_51, %c0_52, %c0_53] : memref<3x8x1xf32, #tpu.memory_space<vmem>>, vector<1x8x1xf32>
    %91 = vector.shape_cast %90 : vector<1x8x1xf32> to vector<8x1xf32>
    %92 = vector.broadcast %91 : vector<8x1xf32> to vector<8x256xf32>
    %93 = arith.addf %89, %92 : vector<8x256xf32>
    %c1_54 = arith.constant 1 : index
    %c0_55 = arith.constant 0 : index
    %c0_56 = arith.constant 0 : index
    %94 = vector.load %arg10[%c1_54, %c0_55, %c0_56] : memref<4x32x8xbf16, #tpu.memory_space<vmem>>, vector<1x32x8xbf16>
    %95 = vector.shape_cast %94 : vector<1x32x8xbf16> to vector<32x8xbf16>
    %96 = arith.truncf %93 : vector<8x256xf32> to vector<8x256xbf16>
    %cst_57 = arith.constant dense<0.000000e+00> : vector<32x256xf32>
    %97 = tpu.matmul %95, %96, %cst_57 {dimension_numbers = #tpu.dot_dimension_numbers<[1], [0], [0], [1], [0, 0, 1, 1], [], []>} : vector<32x8xbf16>, vector<8x256xbf16>, vector<32x256xf32> -> vector<32x256xf32>
    %98 = arith.addf %56, %97 : vector<32x256xf32>
    %99 = vector.extract_strided_slice %15 {offsets = [16, 0], sizes = [8, 256], strides = [1, 1]} : vector<32x256xf32> to vector<8x256xf32>
    %100 = arith.addf %93, %99 : vector<8x256xf32>
    %c2_i32_58 = arith.constant 2 : i32
    %101 = tpu.dynamic_rotate %100 by %c2_i32_58 dim 1 : vector<8x256xf32>, i32 -> vector<8x256xf32>
    %c2_i32_59 = arith.constant 2 : i32
    %102 = vector.broadcast %c2_i32_59 : i32 to vector<8x256xi32>
    %103 = arith.cmpi sge, %16, %102 : vector<8x256xi32>
    %c258_i32_60 = arith.constant 258 : i32
    %104 = vector.broadcast %c258_i32_60 : i32 to vector<8x256xi32>
    %105 = arith.cmpi slt, %16, %104 : vector<8x256xi32>
    %106 = arith.andi %103, %105 : vector<8x256xi1>
    %cst_61 = arith.constant 0.000000e+00 : f32
    %107 = vector.broadcast %cst_61 : f32 to vector<8x256xf32>
    %108 = arith.select %106, %101, %107 : vector<8x256xi1>, vector<8x256xf32>
    %c254_i32_62 = arith.constant 254 : i32
    %109 = tpu.dynamic_rotate %100 by %c254_i32_62 dim 1 : vector<8x256xf32>, i32 -> vector<8x256xf32>
    %c-2_i32_63 = arith.constant -2 : i32
    %110 = vector.broadcast %c-2_i32_63 : i32 to vector<8x256xi32>
    %111 = arith.cmpi sge, %16, %110 : vector<8x256xi32>
    %c254_i32_64 = arith.constant 254 : i32
    %112 = vector.broadcast %c254_i32_64 : i32 to vector<8x256xi32>
    %113 = arith.cmpi slt, %16, %112 : vector<8x256xi32>
    %114 = arith.andi %111, %113 : vector<8x256xi1>
    %cst_65 = arith.constant 0.000000e+00 : f32
    %115 = vector.broadcast %cst_65 : f32 to vector<8x256xf32>
    %116 = arith.select %114, %109, %115 : vector<8x256xi1>, vector<8x256xf32>
    %117 = tpu.concatenate %108, %100, %116 in 0 : vector<8x256xf32>, vector<8x256xf32>, vector<8x256xf32> -> vector<24x256xf32>
    %118 = arith.truncf %117 : vector<24x256xf32> to vector<24x256xbf16>
    %c2 = arith.constant 2 : index
    %c0_66 = arith.constant 0 : index
    %c0_67 = arith.constant 0 : index
    %119 = vector.load %arg6[%c2, %c0_66, %c0_67] : memref<3x8x24xbf16, #tpu.memory_space<vmem>>, vector<1x8x24xbf16>
    %120 = vector.shape_cast %119 : vector<1x8x24xbf16> to vector<8x24xbf16>
    %cst_68 = arith.constant dense<0.000000e+00> : vector<8x256xf32>
    %121 = tpu.matmul %120, %118, %cst_68 {dimension_numbers = #tpu.dot_dimension_numbers<[1], [0], [0], [1], [0, 0, 1, 1], [], []>} : vector<8x24xbf16>, vector<24x256xbf16>, vector<8x256xf32> -> vector<8x256xf32>
    %c2_69 = arith.constant 2 : index
    %c0_70 = arith.constant 0 : index
    %c0_71 = arith.constant 0 : index
    %122 = vector.load %arg7[%c2_69, %c0_70, %c0_71] : memref<3x8x1xf32, #tpu.memory_space<vmem>>, vector<1x8x1xf32>
    %123 = vector.shape_cast %122 : vector<1x8x1xf32> to vector<8x1xf32>
    %124 = vector.broadcast %123 : vector<8x1xf32> to vector<8x256xf32>
    %125 = arith.addf %121, %124 : vector<8x256xf32>
    %cst_72 = arith.constant 0.000000e+00 : f32
    %126 = vector.broadcast %cst_72 : f32 to vector<8x256xf32>
    %127 = arith.maximumf %125, %126 : vector<8x256xf32>
    %c2_73 = arith.constant 2 : index
    %c0_74 = arith.constant 0 : index
    %c0_75 = arith.constant 0 : index
    %128 = vector.load %arg8[%c2_73, %c0_74, %c0_75] : memref<3x8x1xf32, #tpu.memory_space<vmem>>, vector<1x8x1xf32>
    %129 = vector.shape_cast %128 : vector<1x8x1xf32> to vector<8x1xf32>
    %130 = vector.broadcast %129 : vector<8x1xf32> to vector<8x256xf32>
    %131 = arith.mulf %127, %130 : vector<8x256xf32>
    %c2_76 = arith.constant 2 : index
    %c0_77 = arith.constant 0 : index
    %c0_78 = arith.constant 0 : index
    %132 = vector.load %arg9[%c2_76, %c0_77, %c0_78] : memref<3x8x1xf32, #tpu.memory_space<vmem>>, vector<1x8x1xf32>
    %133 = vector.shape_cast %132 : vector<1x8x1xf32> to vector<8x1xf32>
    %134 = vector.broadcast %133 : vector<8x1xf32> to vector<8x256xf32>
    %135 = arith.addf %131, %134 : vector<8x256xf32>
    %c2_79 = arith.constant 2 : index
    %c0_80 = arith.constant 0 : index
    %c0_81 = arith.constant 0 : index
    %136 = vector.load %arg10[%c2_79, %c0_80, %c0_81] : memref<4x32x8xbf16, #tpu.memory_space<vmem>>, vector<1x32x8xbf16>
    %137 = vector.shape_cast %136 : vector<1x32x8xbf16> to vector<32x8xbf16>
    %138 = arith.truncf %135 : vector<8x256xf32> to vector<8x256xbf16>
    %cst_82 = arith.constant dense<0.000000e+00> : vector<32x256xf32>
    %139 = tpu.matmul %137, %138, %cst_82 {dimension_numbers = #tpu.dot_dimension_numbers<[1], [0], [0], [1], [0, 0, 1, 1], [], []>} : vector<32x8xbf16>, vector<8x256xbf16>, vector<32x256xf32> -> vector<32x256xf32>
    %140 = arith.addf %98, %139 : vector<32x256xf32>
    %141 = vector.extract_strided_slice %15 {offsets = [24, 0], sizes = [8, 256], strides = [1, 1]} : vector<32x256xf32> to vector<8x256xf32>
    %c3 = arith.constant 3 : index
    %c0_83 = arith.constant 0 : index
    %c0_84 = arith.constant 0 : index
    %142 = vector.load %arg10[%c3, %c0_83, %c0_84] : memref<4x32x8xbf16, #tpu.memory_space<vmem>>, vector<1x32x8xbf16>
    %143 = vector.shape_cast %142 : vector<1x32x8xbf16> to vector<32x8xbf16>
    %144 = arith.truncf %141 : vector<8x256xf32> to vector<8x256xbf16>
    %cst_85 = arith.constant dense<0.000000e+00> : vector<32x256xf32>
    %145 = tpu.matmul %143, %144, %cst_85 {dimension_numbers = #tpu.dot_dimension_numbers<[1], [0], [0], [1], [0, 0, 1, 1], [], []>} : vector<32x8xbf16>, vector<8x256xbf16>, vector<32x256xf32> -> vector<32x256xf32>
    %146 = arith.addf %140, %145 : vector<32x256xf32>
    %c0_86 = arith.constant 0 : index
    %c0_87 = arith.constant 0 : index
    %147 = vector.load %arg11[%c0_86, %c0_87] : memref<32x1xf32, #tpu.memory_space<vmem>>, vector<32x1xf32>
    %148 = vector.broadcast %147 : vector<32x1xf32> to vector<32x256xf32>
    %149 = arith.addf %146, %148 : vector<32x256xf32>
    %cst_88 = arith.constant 0.000000e+00 : f32
    %150 = vector.broadcast %cst_88 : f32 to vector<32x256xf32>
    %151 = arith.maximumf %149, %150 : vector<32x256xf32>
    %c0_89 = arith.constant 0 : index
    %c0_90 = arith.constant 0 : index
    %152 = vector.load %arg12[%c0_89, %c0_90] : memref<32x1xf32, #tpu.memory_space<vmem>>, vector<32x1xf32>
    %153 = vector.broadcast %152 : vector<32x1xf32> to vector<32x256xf32>
    %154 = arith.mulf %151, %153 : vector<32x256xf32>
    %c0_91 = arith.constant 0 : index
    %c0_92 = arith.constant 0 : index
    %155 = vector.load %arg13[%c0_91, %c0_92] : memref<32x1xf32, #tpu.memory_space<vmem>>, vector<32x1xf32>
    %156 = vector.broadcast %155 : vector<32x1xf32> to vector<32x256xf32>
    %157 = arith.addf %154, %156 : vector<32x256xf32>
    %c0_93 = arith.constant 0 : index
    %c0_94 = arith.constant 0 : index
    %158 = vector.load %arg14[%c0_93, %c0_94] : memref<32x16xbf16, #tpu.memory_space<vmem>>, vector<32x16xbf16>
    %cst_95 = arith.constant dense<0.000000e+00> : vector<32x256xf32>
    %159 = tpu.matmul %158, %2, %cst_95 {dimension_numbers = #tpu.dot_dimension_numbers<[1], [0], [0], [1], [0, 0, 1, 1], [], []>} : vector<32x16xbf16>, vector<16x256xbf16>, vector<32x256xf32> -> vector<32x256xf32>
    %160 = arith.addf %157, %159 : vector<32x256xf32>
    %c255_i32 = arith.constant 255 : i32
    %161 = tpu.dynamic_rotate %160 by %c255_i32 dim 1 : vector<32x256xf32>, i32 -> vector<32x256xf32>
    %162 = arith.maximumf %160, %161 : vector<32x256xf32>
    %c0_96 = arith.constant 0 : index
    %c0_97 = arith.constant 0 : index
    %163 = vector.load %arg15[%c0_96, %c0_97] : memref<256x128xf32, #tpu.memory_space<vmem>>, vector<256x128xf32>
    %cst_98 = arith.constant dense<0.000000e+00> : vector<32x128xf32>
    %164 = tpu.matmul %162, %163, %cst_98 {dimension_numbers = #tpu.dot_dimension_numbers<[1], [0], [0], [1], [0, 0, 1, 1], [], []>} : vector<32x256xf32>, vector<256x128xf32>, vector<32x128xf32> -> vector<32x128xf32>
    %cst_99 = arith.constant dense<0.000000e+00> : vector<32xf32>
    %165 = vector.multi_reduction <add>, %164, %cst_99 [1] : vector<32x128xf32> to vector<32xf32>
    %166 = vector.shape_cast %165 : vector<32xf32> to vector<32x1xf32>
    %cst_100 = arith.constant 7.812500e-03 : f32
    %167 = vector.broadcast %cst_100 : f32 to vector<32x1xf32>
    %168 = arith.mulf %166, %167 : vector<32x1xf32>
    %c0_101 = arith.constant 0 : index
    %c0_102 = arith.constant 0 : index
    %169 = vector.load %arg17[%c0_101, %c0_102] : memref<32x32xf32, #tpu.memory_space<vmem>>, vector<32x32xf32>
    %cst_103 = arith.constant dense<0.000000e+00> : vector<32x1xf32>
    %170 = tpu.matmul %169, %168, %cst_103 {dimension_numbers = #tpu.dot_dimension_numbers<[1], [0], [0], [1], [0, 0, 1, 1], [], []>} : vector<32x32xf32>, vector<32x1xf32>, vector<32x1xf32> -> vector<32x1xf32>
    %c0_104 = arith.constant 0 : index
    %c0_105 = arith.constant 0 : index
    %171 = vector.load %arg18[%c0_104, %c0_105] : memref<32x1xf32, #tpu.memory_space<vmem>>, vector<32x1xf32>
    %172 = arith.addf %170, %171 : vector<32x1xf32>
    %cst_106 = arith.constant 0.000000e+00 : f32
    %173 = vector.broadcast %cst_106 : f32 to vector<32x1xf32>
    %174 = arith.subf %173, %172 : vector<32x1xf32>
    %175 = math.exp %174 : vector<32x1xf32>
    %cst_107 = arith.constant 1.000000e+00 : f32
    %176 = vector.broadcast %cst_107 : f32 to vector<32x1xf32>
    %177 = arith.addf %176, %175 : vector<32x1xf32>
    %cst_108 = arith.constant 1.000000e+00 : f32
    %178 = vector.broadcast %cst_108 : f32 to vector<32x1xf32>
    %179 = arith.divf %178, %177 : vector<32x1xf32>
    %c0_109 = arith.constant 0 : index
    %c0_110 = arith.constant 0 : index
    %180 = vector.load %arg16[%c0_109, %c0_110] : memref<32x1xf32, #tpu.memory_space<vmem>>, vector<32x1xf32>
    %181 = vector.broadcast %180 : vector<32x1xf32> to vector<32x128xf32>
    %182 = arith.addf %164, %181 : vector<32x128xf32>
    %183 = vector.broadcast %179 : vector<32x1xf32> to vector<32x128xf32>
    %184 = arith.mulf %182, %183 : vector<32x128xf32>
    %c0_111 = arith.constant 0 : index
    %c0_112 = arith.constant 0 : index
    %c0_113 = arith.constant 0 : index
    %185 = vector.load %arg19[%c0_111, %c0_112, %c0_113] : memref<1x32x128xf32, #tpu.memory_space<vmem>>, vector<1x32x128xf32>
    %186 = vector.shape_cast %185 : vector<1x32x128xf32> to vector<32x128xf32>
    %187 = vector.shape_cast %184 : vector<32x128xf32> to vector<1x32x128xf32>
    tpu.vector_store %arg19[%c0_111, %c0_112, %c0_113], %187 {strides = array<i32>} : memref<1x32x128xf32, #tpu.memory_space<vmem>>, vector<1x32x128xf32>,
    return
  }
  func.func @transform_0(%arg0: i32) -> (i32, i32, i32) {
    %c0_i32 = arith.constant 0 : i32
    %c0_i32_0 = arith.constant 0 : i32
    %c0_i32_1 = arith.constant 0 : i32
    return %arg0, %c0_i32, %c0_i32_0 : i32, i32, i32
  }
  func.func @transform_1(%arg0: i32) -> (i32, i32) {
    %c0_i32 = arith.constant 0 : i32
    %c0_i32_0 = arith.constant 0 : i32
    %c0_i32_1 = arith.constant 0 : i32
    return %c0_i32, %c0_i32_0 : i32, i32
  }
  func.func @transform_2(%arg0: i32) -> (i32, i32) {
    %c0_i32 = arith.constant 0 : i32
    %c0_i32_0 = arith.constant 0 : i32
    %c0_i32_1 = arith.constant 0 : i32
    return %c0_i32, %c0_i32_0 : i32, i32
  }
  func.func @transform_3(%arg0: i32) -> (i32, i32) {
    %c0_i32 = arith.constant 0 : i32
    %c0_i32_0 = arith.constant 0 : i32
    %c0_i32_1 = arith.constant 0 : i32
    return %c0_i32, %c0_i32_0 : i32, i32
  }
  func.func @transform_4(%arg0: i32) -> (i32, i32) {
    %c0_i32 = arith.constant 0 : i32
    %c0_i32_0 = arith.constant 0 : i32
    %c0_i32_1 = arith.constant 0 : i32
    return %c0_i32, %c0_i32_0 : i32, i32
  }
  func.func @transform_5(%arg0: i32) -> (i32, i32, i32) {
    %c0_i32 = arith.constant 0 : i32
    %c0_i32_0 = arith.constant 0 : i32
    %c0_i32_1 = arith.constant 0 : i32
    %c0_i32_2 = arith.constant 0 : i32
    return %c0_i32, %c0_i32_0, %c0_i32_1 : i32, i32, i32
  }
  func.func @transform_6(%arg0: i32) -> (i32, i32, i32) {
    %c0_i32 = arith.constant 0 : i32
    %c0_i32_0 = arith.constant 0 : i32
    %c0_i32_1 = arith.constant 0 : i32
    %c0_i32_2 = arith.constant 0 : i32
    return %c0_i32, %c0_i32_0, %c0_i32_1 : i32, i32, i32
  }
  func.func @transform_7(%arg0: i32) -> (i32, i32, i32) {
    %c0_i32 = arith.constant 0 : i32
    %c0_i32_0 = arith.constant 0 : i32
    %c0_i32_1 = arith.constant 0 : i32
    %c0_i32_2 = arith.constant 0 : i32
    return %c0_i32, %c0_i32_0, %c0_i32_1 : i32, i32, i32
  }
  func.func @transform_8(%arg0: i32) -> (i32, i32, i32) {
    %c0_i32 = arith.constant 0 : i32
    %c0_i32_0 = arith.constant 0 : i32
    %c0_i32_1 = arith.constant 0 : i32
    %c0_i32_2 = arith.constant 0 : i32
    return %c0_i32, %c0_i32_0, %c0_i32_1 : i32, i32, i32
  }
  func.func @transform_9(%arg0: i32) -> (i32, i32, i32) {
    %c0_i32 = arith.constant 0 : i32
    %c0_i32_0 = arith.constant 0 : i32
    %c0_i32_1 = arith.constant 0 : i32
    %c0_i32_2 = arith.constant 0 : i32
    return %c0_i32, %c0_i32_0, %c0_i32_1 : i32, i32, i32
  }
  func.func @transform_10(%arg0: i32) -> (i32, i32) {
    %c0_i32 = arith.constant 0 : i32
    %c0_i32_0 = arith.constant 0 : i32
    %c0_i32_1 = arith.constant 0 : i32
    return %c0_i32, %c0_i32_0 : i32, i32
  }
  func.func @transform_11(%arg0: i32) -> (i32, i32) {
    %c0_i32 = arith.constant 0 : i32
    %c0_i32_0 = arith.constant 0 : i32
    %c0_i32_1 = arith.constant 0 : i32
    return %c0_i32, %c0_i32_0 : i32, i32
  }
  func.func @transform_12(%arg0: i32) -> (i32, i32) {
    %c0_i32 = arith.constant 0 : i32
    %c0_i32_0 = arith.constant 0 : i32
    %c0_i32_1 = arith.constant 0 : i32
    return %c0_i32, %c0_i32_0 : i32, i32
  }
  func.func @transform_13(%arg0: i32) -> (i32, i32) {
    %c0_i32 = arith.constant 0 : i32
    %c0_i32_0 = arith.constant 0 : i32
    %c0_i32_1 = arith.constant 0 : i32
    return %c0_i32, %c0_i32_0 : i32, i32
  }
  func.func @transform_14(%arg0: i32) -> (i32, i32) {
    %c0_i32 = arith.constant 0 : i32
    %c0_i32_0 = arith.constant 0 : i32
    %c0_i32_1 = arith.constant 0 : i32
    return %c0_i32, %c0_i32_0 : i32, i32
  }
  func.func @transform_15(%arg0: i32) -> (i32, i32) {
    %c0_i32 = arith.constant 0 : i32
    %c0_i32_0 = arith.constant 0 : i32
    %c0_i32_1 = arith.constant 0 : i32
    return %c0_i32, %c0_i32_0 : i32, i32
  }
  func.func @transform_16(%arg0: i32) -> (i32, i32) {
    %c0_i32 = arith.constant 0 : i32
    %c0_i32_0 = arith.constant 0 : i32
    %c0_i32_1 = arith.constant 0 : i32
    return %c0_i32, %c0_i32_0 : i32, i32
  }
  func.func @transform_17(%arg0: i32) -> (i32, i32) {
    %c0_i32 = arith.constant 0 : i32
    %c0_i32_0 = arith.constant 0 : i32
    %c0_i32_1 = arith.constant 0 : i32
    return %c0_i32, %c0_i32_0 : i32, i32
  }
  func.func @transform_18(%arg0: i32) -> (i32, i32, i32) {
    %c0_i32 = arith.constant 0 : i32
    %c0_i32_0 = arith.constant 0 : i32
    %c0_i32_1 = arith.constant 0 : i32
    return %arg0, %c0_i32, %c0_i32_0 : i32, i32, i32
  }
}

</mosaic_0001>

<bundles_post_ra>
// kernel: tpu_custom_call.1
= control target key start
LH: loop header
LB: loop body
LE: loop exit
PB: predicated region body
PF: predicated region fallthrough
CT: control target
= control target key end

     0   :  { %s3034_s0 = inlined_call_operand.vmem [shape: f32[2,16,256], index: 0, kind: input, shape index: {}]   ;;  %s3035_s1 = inlined_call_operand.vmem [shape: bf16[32,16], index: 1, kind: input, shape index: {}]   ;;  %s3036_s2 = inlined_call_operand.vmem [shape: f32[32,1], index: 2, kind: input, shape index: {}]   ;;  %s3037_s3 = inlined_call_operand.vmem [shape: f32[32,1], index: 3, kind: input, shape index: {}]   ;;  %s3038_s4 = inlined_call_operand.vmem [shape: f32[32,1], index: 4, kind: input, shape index: {}]   ;;  %s3039_s5 = inlined_call_operand.vmem [shape: bf16[3,8,24], index: 5, kind: input, shape index: {}]   ;;  %s3040_s6 = inlined_call_operand.vmem [shape: f32[3,8,1], index: 6, kind: input, shape index: {}]   ;;  %s3041_s7 = inlined_call_operand.vmem [shape: f32[3,8,1], index: 7, kind: input, shape index: {}]   ;;  %s3042_s8 = inlined_call_operand.vmem [shape: f32[3,8,1], index: 8, kind: input, shape index: {}]   ;;  %s3043_s9 = inlined_call_operand.vmem [shape: bf16[4,32,8], index: 9, kind: input, shape index: {}]   ;;  %s3044_s10 = inlined_call_operand.vmem [shape: f32[32,1], index: 10, kind: input, shape index: {}]   ;;  %s3045_s11 = inlined_call_operand.vmem [shape: f32[32,1], index: 11, kind: input, shape index: {}]   ;;  %s3046_s12 = inlined_call_operand.vmem [shape: f32[32,1], index: 12, kind: input, shape index: {}]   ;;  %s3047_s13 = inlined_call_operand.vmem [shape: bf16[32,16], index: 13, kind: input, shape index: {}]   ;;  %s3048_s14 = inlined_call_operand.vmem [shape: f32[256,128], index: 14, kind: input, shape index: {}]   ;;  %s3049_s15 = inlined_call_operand.vmem [shape: f32[32,1], index: 15, kind: input, shape index: {}]   ;;  %s3050_s16 = inlined_call_operand.vmem [shape: f32[32,32], index: 16, kind: input, shape index: {}]   ;;  %s3051_s17 = inlined_call_operand.vmem [shape: f32[32,1], index: 17, kind: input, shape index: {}]   ;;  %s3052_s18 = inlined_call_operand.hbm [shape: f32[2,32,128], index: 18, kind: output, shape index: {}]  }
   0x1   :  { %3065 = sst [smem:[#allocation11_spill]] %s3034_s0 }
   0x2   :  { %3066 = sst [smem:[#allocation12_spill]] %s3035_s1 }
   0x3   :  { %3067 = sst [smem:[#allocation13_spill]] %s3036_s2 }
   0x4   :  { %3068 = sst [smem:[#allocation14_spill]] %s3037_s3 }
   0x5   :  { %3069 = sst [smem:[#allocation15_spill]] %s3038_s4 }
   0x6   :  { %3070 = sst [smem:[#allocation16_spill]] %s3052_s18 }
   0x7   :  { %23 = vsyncpa [#allocation3], 0 }
   0x8   :  { %25 = vsyncpa [#allocation3 + $0x1], 0  ;;  %s2460_s27 = smov 0   ;;  %s2462_s28 = smov 0  }
   0x9   :  { %s2464_s29 = smov 0   ;;  %s2466_s30 = smov 0  }
   0xa LB: > { %3071 = sst [smem:[#allocation5_spill]] %s2343_s27  ;;  %s2481_s0 = sadd.s32 4294967295, %s2355_s30   ;;  %s2355_s30 = sphi %s2466_s30, %s3093_s30   ;;  %s2351_s29 = sphi %s2464_s29, %s3098_s29   ;;  %s2347_s28 = sphi %s2462_s28, %s3097_s28   ;;  %s2343_s27 = sphi %s2460_s27, %s3096_s27  }
   0xb   : > { %3072 = sst [smem:[#allocation6_spill]] %s2351_s29  ;;  %s2020_s19 = sadd.s32 4294967294, %s2355_s30  }
   0xc   : > { %3073 = sst [smem:[#allocation7_spill]] %s2355_s30  ;;  %s2485_s1 = sadd.s32 1, %s2355_s30  }
   0xd   : > { %3074 = sst [smem:[#allocation8_spill]] %s2485_s1  ;;  %s421_s20 = sadd.s32 1, %s2351_s29 }
   0xe   : > { %s418_s21 = ssub.s32 %s2355_s30, %s2485_s1  ;;  %p431_p0 = scmp.ne.s32.totalorder %s2351_s29, %s2347_s28 }
   0xf   : > { %p419_p1 = scmp.eq.s32.totalorder %s418_s21, 0  ;;  %p432_p2 = scmp.eq.s32.totalorder %s2481_s0, 1 }
  0x10   : > { %p437_p3 = scmp.ne.s32.totalorder %s2347_s28, %s2343_s27  ;;  %p438_p4 = scmp.eq.s32.totalorder %s2020_s19, 1 }
  0x11   : > { %s2496_s22 = scalar_select %p419_p1, %s2351_s29, %s421_s20  }
  0x12   : > { %p2498_p5 = por %p432_p2, %p431_p0  ;;  %p2502_p6 = por %p438_p4, %p437_p3 }
  0x13   : > { %3075 = sst [smem:[#allocation9_spill]] %s2496_s22  ;;  %p2023_p7 = scmp.ge.s32.totalorder %s2355_s30, 1 }
  0x14   : > { %s3077_s23 = scalar_select %p2502_p6, 1, 0 }
  0x15   : > { %p515_p8 = scmp.lt.s32.totalorder %s2355_s30, 3 }
  0x16   : > { %3078 = sst [smem:[#allocation10_spill]] %s3077_s23 }
  0x17   : > { %p516_p9 = pnand %p2023_p7, %p515_p8 }
  0x18   : > { %p569_p10 = scmp.lt.s32.totalorder (!%p516_p9), %s2481_s0, 1  ;;  %s3079_s26 = sld [smem:[#allocation13_spill]] (!%p516_p9) }
  0x19   : > { %519 = sbr.rel (%p516_p9) target bundleno = 2324 (0x914), region = 92  ;;  %s3080_s3 = sld [smem:[#allocation14_spill]] (!%p516_p9) }
  0x1a   : > { %s3081_s4 = sld [smem:[#allocation15_spill]] (!%p516_p9)  ;;  %s2361_s23 = smov (!%p516_p9), 127  }
  0x1b   : > { %s3082_s24 = sld [smem:[#allocation11_spill]] (!%p516_p9)  ;;  %s2100_s20 = sshll.u32 (!%p516_p9), %s2481_s0, 9 }
  0x1c   : > { %s3083_s30 = sld [smem:[#allocation12_spill]] (!%p516_p9) }
  0x1d   : > { %s3089_s22 = sld [smem:[#allocation16_spill]] (!%p516_p9) }
  0x1e   : > { %v2357_v0 = vmov 0   ;;  %v585_v1 = vld [vmem:[%s3079_s26] sm:$0xff]  ;;  %s570_s21 = scalar_select %p569_p10, %s2481_s0, 1  ;;  %vm619_vm0 = vcmask 130048   ;;  %v586_v27 = vld [vmem:[%s3079_s26 + $0x8] sm:$0xff]  ;;  %v751_v32 = vlaneseq  ;;  %vm799_vm4 = vcmask 1043456  }
  0x1f   : > { %658 = vmatprep.mubr.bf16.mxu0 %v2357_v0  ;;  %2215 = vset.pattern.permute.xlu0 %v2357_v0  ;;  %v687_v2 = vld [vmem:[%s3080_s3] sm:$0xff]  ;;  %v688_v29 = vld [vmem:[%s3080_s3 + $0x8] sm:$0xff]  ;;  %vm2360_vm6 = vmmov 1   ;;  %vm795_vm8 = vcmask 195584   ;;  %vm989_vm9 = vcmask 64512   ;;  %vm1766_vm11 = vcmask 261120  }
  0x20   : > { %591 = vperm.xlu0 %2215, %v585_v1   ;;  %2216 = vset.pattern.permute.xlu1 %v2357_v0  ;;  %v719_v3 = vld [vmem:[%s3081_s4] sm:$0xff]  ;;  %s2099_s1 = sshll.u32 %s570_s21, 5  ;;  %v720_v31 = vld [vmem:[%s3081_s4 + $0x8] sm:$0xff]  ;;  %v2564_v33 = vand.u32 127, %v751_v32  ;;  %v721_v32 = vld [vmem:[%s3081_s4 + $0x10] sm:$0xff]  ;;  %s566_s21 = sand.u32 1, %s2347_s28  }
  0x21   : > { %725 = vperm.xlu1 %2216, %v719_v3   ;;  %668 = vmatprep.mubr.bf16.mxu1 %v2357_v0  ;;  %s573_s25 = scalar_lea.vmem %s3082_s24, %s2099_s1  ;;  %s3062_s1 = smov 126   ;;  %v789_v26 = vld [vmem:[%s3040_s6] sm:$0xff] }
  0x22   : > { %v576_v4 = vld [vmem:[%s573_s25 + $0x8] sm:$0xff]  ;;  %v578_v5 = vld [vmem:[%s573_s25 + $0x18] sm:$0xff]  ;;  %v575_v6 = vld [vmem:[%s573_s25] sm:$0xff]  ;;  %s3084_s18 = smov %s3083_s30  ;;  %v2567_v34 = vadd.s32 128, %v2564_v33  ;;  %vm758_vm1 = vcmp.lt.s32.totalorder %v2564_v33, 2  ;;  %vm773_vm2 = vcmp.lt.s32.totalorder %v2564_v33, 126 }
  0x23   : > { %v2526_v7 = vpack.c.bf16 %v578_v5, %v576_v4  ;;  %v577_v8 = vld [vmem:[%s573_s25 + $0x10] sm:$0xff]  ;;  %v2267_v9 = vld [vmem:[%s3083_s30] sm:$0xff]   ;;  %v2268_v12 = vld [vmem:[%s3084_s18 + $0x8] sm:$0xff]   ;;  %s3064_s30 = smov 2   ;;  %vm761_vm5 = vcmp.ge.s32.totalorder %v2564_v33, 2  ;;  %s3087_s24 = smov 126  }
  0x24   : > { %693 = vperm.xlu0 %2215, %v687_v2   ;;  %v2531_v10 = vpack.c.bf16 %v577_v8, %v575_v6  ;;  %v849_v28 = vld [vmem:[%s3041_s7] sm:$0xff]  ;;  %vm779_vm3 = vcmp.lt.s32.totalorder %v2567_v34, 254  ;;  %vm2585_vm7 = vmpackc.low %vm2360_vm6, %vm761_vm5  ;;  %s3088_s25 = smov 2   ;;  %v2059_v34 = vld [vmem:[%s3039_s5 + $0x8] sm:$0xf]  ;;  %vm1612_vm10 = vcmp.lt.s32.totalorder %v2564_v33, 127 }
  0x25   : > { %640 = vmatprep.subr.bf16.mxu0 %v2526_v7  ;;  %2167 = vmatprep.subr.bf16.mxu1 %v2526_v7  ;;  %v857_v30 = vld [vmem:[%s3042_s8] sm:$0xff] }
  0x26   : > { %641 = vmatpush1.bf16.msra.mxu0 %v2531_v10  ;;  %2168 = vmatpush1.bf16.msra.mxu1 %v2531_v10  ;;  %v788_v52 = vld [vmem:[%s3039_s5] sm:$0xf] }
  0x29   : > { %2029 = vmatmul.mubr.msk.bf16.vlgmr.msra.gmra.mxu0 %vm619_vm0, %v2267_v9  ;;  %2030 = vmatmul.mubr.msk.bf16.vlgmr.msra.gmra.mxu1 %vm619_vm0, %v2268_v12 }
  0x2a   : > { %1034 = vmatprep.mubr.bf16.mxu0 %v2357_v0  ;;  %838 = vmatprep.mubr.bf16.mxu1 %v2357_v0 }
  0x9b   : > { %v592_v11 = vpop.permute.xlu0 %591 }
  0x9c   : > { %v726_v21 = vpop.permute.xlu1 %725 }
  0x9f   : > { %v694_v18 = vpop.permute.xlu0 %693 }
  0xe9   : > { %v660_v13 = vpop.f32.mrf.mxu0  ;;  %v2596_v53 = vpop.f32.mrf.mxu1 }
  0xea   : > { %v661_v14 = vadd.f32 %v660_v13, %v592_v11 }
  0xeb   : > { %v662_v15 = vpop.f32.mrf.mxu0  ;;  %v2598_v54 = vpop.f32.mrf.mxu1 }
  0xec   : > { %v679_v16 = vmax.f32 %v661_v14, 0.0  ;;  %v663_v17 = vadd.f32 %v662_v15, %v592_v11 }
  0xed   : > { %v664_v55 = vpop.f32.mrf.mxu0  ;;  %v2600_v58 = vpop.f32.mrf.mxu1 }
  0xee   : > { %v711_v19 = vmul.f32 %v694_v18, %v679_v16  ;;  %v680_v20 = vmax.f32 %v663_v17, 0.0 }
  0xef   : > { %v666_v59 = vpop.f32.mrf.mxu0  ;;  %v2602_v60 = vpop.f32.mrf.mxu1 }
  0xf0   : > { %v712_v22 = vmul.f32 %v694_v18, %v680_v20  ;;  %v743_v23 = vadd.f32 %v726_v21, %v711_v19 }
  0xf2   : > { %v744_v24 = vadd.f32 %v726_v21, %v712_v22 }
  0xf4   : > { %v2222_v25 = vpack.i.bf16 %v744_v24, %v743_v23 }
  0xf6   : > { %2223 = vrot.lane.b32.xlu0 %v2222_v25, %s3064_s30  ;;  %2218 = vrot.lane.b32.xlu1 %v2222_v25, %s3062_s1  ;;  %s2362_s1 = smov [#allocation2]  }
  0xfa   : > { %792 = vperm.xlu0 %2215, %v789_v26   ;;  %596 = vperm.xlu1 %2216, %v586_v27   ;;  %v2037_v27 = vld [vmem:[%s3040_s6 + $0x8] sm:$0xff] }
  0xfe   : > { %852 = vperm.xlu0 %2215, %v849_v28   ;;  %698 = vperm.xlu1 %2216, %v688_v29   ;;  %v587_v28 = vld [vmem:[%s3079_s26 + $0x10] sm:$0xff]  ;;  %v2043_v29 = vld [vmem:[%s3041_s7 + $0x8] sm:$0xff] }
 0x102   : > { %860 = vperm.xlu0 %2215, %v857_v30   ;;  %730 = vperm.xlu1 %2216, %v720_v31   ;;  %v689_v30 = vld [vmem:[%s3080_s3 + $0x10] sm:$0xff]  ;;  %v2044_v31 = vld [vmem:[%s3042_s8 + $0x8] sm:$0xff] }
 0x168   : > { %v2224_v35 = vpop.permute.xlu0 %2223  ;;  %v2219_v36 = vpop.permute.xlu1 %2218 }
 0x169   : > { %v2226_v37 = vunpack.i.h.bf16 %v2224_v35  ;;  %v2225_v38 = vunpack.i.l.bf16 %v2224_v35  ;;  %v2221_v39 = vunpack.i.h.bf16 %v2219_v36  ;;  %v2220_v40 = vunpack.i.l.bf16 %v2219_v36 }
 0x16b   : > { %v775_v41 = vsel %vm773_vm2, %v2221_v39, %v2220_v40  ;;  %v774_v42 = vsel %vm773_vm2, %v2220_v40, %v2221_v39  ;;  %v759_v45 = vsel %vm758_vm1, %v2225_v38, %v2226_v37  ;;  %v760_v48 = vsel %vm758_vm1, %v2226_v37, %v2225_v38 }
 0x16c   : > { %v783_v43 = vsel %vm779_vm3, %v775_v41, 0.0  ;;  %v786_v44 = vpack.c.bf16 %v774_v42, %v774_v42  ;;  %v785_v49 = vpack.c.bf16 %v744_v24, %v759_v45  ;;  %v2033_v51 = vpack.c.bf16 %v743_v23, %v760_v48 }
 0x16d   : > { %v787_v46 = vpack.c.bf16 %v783_v43, %v783_v43 }
 0x16e   : > { %v801_v47 = vsel %vm799_vm4, %v786_v44, 0 }
 0x16f   : > { %2031 = vmatprep.subr.msk.bf16.mxu1 %vm799_vm4, %v787_v46 }
 0x170   : > { %819 = vmatpush1.bf16.msra.mxu1 %v801_v47 }
 0x171   : > { %820 = vmatprep.subr.bf16.mxu1 %v785_v49 }
 0x174   : > { %2034 = vmatpush1.bf16.msk.msra.mxu1 %vm2585_vm7, %v2033_v51 }
 0x175   : > { %v793_v56 = vpop.permute.xlu0 %792  ;;  %v597_v57 = vpop.permute.xlu1 %596 }
 0x176   : > { %v665_v61 = vadd.f32 %v664_v55, %v597_v57  ;;  %v667_v62 = vadd.f32 %v666_v59, %v597_v57  ;;  %v2270_v59 = vld [vmem:[%s3043_s9] sm:$0xff]  }
 0x177   : > { %2035 = vmatmul.mubr.msk.bf16.vlgmr.msra.gmra.mxu1 %vm795_vm8, %v788_v52 }
 0x178   : > { %943 = vmatprep.mubr.bf16.mxu1 %v2357_v0  ;;  %v681_v5 = vmax.f32 %v665_v61, 0.0  ;;  %v682_v6 = vmax.f32 %v667_v62, 0.0 }
 0x179   : > { %v853_v63 = vpop.permute.xlu0 %852  ;;  %v699_v1 = vpop.permute.xlu1 %698 }
 0x17a   : > { %v713_v17 = vmul.f32 %v699_v1, %v681_v5  ;;  %v714_v18 = vmul.f32 %v699_v1, %v682_v6  ;;  %v2272_v5 = vld [vmem:[%s3043_s9 + $0x8] sm:$0xff]  }
 0x17d   : > { %v861_v12 = vpop.permute.xlu0 %860  ;;  %v731_v15 = vpop.permute.xlu1 %730 }
 0x17e   : > { %v745_v21 = vadd.f32 %v731_v15, %v713_v17  ;;  %v746_v22 = vadd.f32 %v731_v15, %v714_v18 }
 0x237   : > { %v840_v2 = vpop.f32.mrf.mxu1 }
 0x238   : > { %v841_v3 = vadd.f32 %v840_v2, %v793_v56 }
 0x239   : > { %v842_v4 = vpop.f32.mrf.mxu1 }
 0x23a   : > { %v847_v8 = vmax.f32 %v841_v3, 0.0  ;;  %v843_v9 = vadd.f32 %v842_v4, %v793_v56  ;;  %v2036_v56 = vld [vmem:[%s3039_s5 + $0x4] sm:$0xf] }
 0x23b   : > { %v844_v11 = vpop.f32.mrf.mxu1 }
 0x23c   : > { %v855_v13 = vmul.f32 %v853_v63, %v847_v8  ;;  %v848_v14 = vmax.f32 %v843_v9, 0.0 }
 0x23d   : > { %v845_v16 = vpop.f32.mrf.mxu1 }
 0x23e   : > { %v863_v19 = vadd.f32 %v861_v12, %v855_v13  ;;  %v856_v20 = vmul.f32 %v853_v63, %v848_v14 }
 0x240   : > { %v864_v23 = vadd.f32 %v861_v12, %v856_v20  ;;  %v871_v24 = vadd.f32 %v863_v19, %v745_v21  ;;  %v869_v55 = vpack.c.bf16 %v863_v19, %v863_v19 }
 0x242   : > { %v872_v25 = vadd.f32 %v864_v23, %v746_v22  ;;  %v870_v52 = vpack.c.bf16 %v864_v23, %v864_v23  ;;  %v1072_v57 = vsel %vm799_vm4, %v869_v55, 0  ;;  %v1454_v55 = vld [vmem:[%s3045_s11 + $0x18] sm:$0xff] }
 0x244   : > { %v2232_v26 = vpack.i.bf16 %v872_v25, %v871_v24 }
 0x246   : > { %2233 = vrot.lane.b32.xlu0 %v2232_v26, %s3064_s30  ;;  %2228 = vrot.lane.b32.xlu1 %v2232_v26, %s3087_s24 }
 0x24a   : > { %899 = vperm.xlu0 %2215, %v2037_v27   ;;  %601 = vperm.xlu1 %2216, %v587_v28  }
 0x24e   : > { %958 = vperm.xlu0 %2215, %v2043_v29   ;;  %703 = vperm.xlu1 %2216, %v689_v30  }
 0x252   : > { %967 = vperm.xlu0 %2215, %v2044_v31   ;;  %735 = vperm.xlu1 %2216, %v721_v32   ;;  %v2269_v31 = vld [vmem:[%s3043_s9 + $0x10] sm:$0xff]  }
 0x253   : > { %v2066_v32 = vld [vmem:[%s3041_s7 + $0x10] sm:$0xff] }
 0x2b8   : > { %v2234_v35 = vpop.permute.xlu0 %2233  ;;  %v2229_v36 = vpop.permute.xlu1 %2228 }
 0x2b9   : > { %v2236_v37 = vunpack.i.h.bf16 %v2234_v35  ;;  %v2235_v38 = vunpack.i.l.bf16 %v2234_v35  ;;  %v2231_v39 = vunpack.i.h.bf16 %v2229_v36  ;;  %v2230_v40 = vunpack.i.l.bf16 %v2229_v36  ;;  %v2060_v35 = vld [vmem:[%s3040_s6 + $0x10] sm:$0xff] }
 0x2ba   : > { %v2067_v36 = vld [vmem:[%s3042_s8 + $0x10] sm:$0xff] }
 0x2bb   : > { %v886_v41 = vsel %vm773_vm2, %v2231_v39, %v2230_v40  ;;  %v885_v42 = vsel %vm773_vm2, %v2230_v40, %v2231_v39  ;;  %v877_v45 = vsel %vm758_vm1, %v2235_v38, %v2236_v37  ;;  %v878_v48 = vsel %vm758_vm1, %v2236_v37, %v2235_v38  ;;  %v588_v37 = vld [vmem:[%s3079_s26 + $0x18] sm:$0xff] }
 0x2bc   : > { %v888_v43 = vsel %vm779_vm3, %v886_v41, 0.0  ;;  %v891_v44 = vpack.c.bf16 %v885_v42, %v885_v42  ;;  %v890_v49 = vpack.c.bf16 %v872_v25, %v877_v45  ;;  %v2040_v51 = vpack.c.bf16 %v871_v24, %v878_v48  ;;  %v2271_v38 = vld [vmem:[%s3043_s9 + $0x18] sm:$0xff]   ;;  %v1412_v41 = vld [vmem:[%s3044_s10 + $0x8] sm:$0xff]  ;;  %v1411_v42 = vld [vmem:[%s3044_s10] sm:$0xff] }
 0x2bd   : > { %v892_v46 = vpack.c.bf16 %v888_v43, %v888_v43  ;;  %v722_v39 = vld [vmem:[%s3081_s4 + $0x18] sm:$0xff]  ;;  %v1483_v43 = vld [vmem:[%s3046_s12] sm:$0xff]  ;;  %v1452_v45 = vld [vmem:[%s3045_s11 + $0x8] sm:$0xff] }
 0x2be   : > { %v906_v47 = vsel %vm799_vm4, %v891_v44, 0  ;;  %v690_v40 = vld [vmem:[%s3080_s3 + $0x18] sm:$0xff]  ;;  %v1451_v44 = vld [vmem:[%s3045_s11] sm:$0xff]  ;;  %v1484_v48 = vld [vmem:[%s3046_s12 + $0x8] sm:$0xff] }
 0x2bf   : > { %2038 = vmatprep.subr.msk.bf16.mxu1 %vm799_vm4, %v892_v46  ;;  %v1413_v46 = vld [vmem:[%s3044_s10 + $0x10] sm:$0xff] }
 0x2c0   : > { %924 = vmatpush1.bf16.msra.mxu1 %v906_v47  ;;  %v1414_v47 = vld [vmem:[%s3044_s10 + $0x18] sm:$0xff] }
 0x2c1   : > { %925 = vmatprep.subr.bf16.mxu1 %v890_v49  ;;  %v1485_v49 = vld [vmem:[%s3046_s12 + $0x10] sm:$0xff] }
 0x2c4   : > { %2041 = vmatpush1.bf16.msk.msra.mxu1 %vm2585_vm7, %v2040_v51  ;;  %v1453_v51 = vld [vmem:[%s3045_s11 + $0x10] sm:$0xff] }
 0x2c5   : > { %2056 = vmatprep.subr.msk.bf16.mxu1 %vm799_vm4, %v870_v52  ;;  %v900_v61 = vpop.permute.xlu0 %899  ;;  %v602_v62 = vpop.permute.xlu1 %601  ;;  %v1486_v52 = vld [vmem:[%s3046_s12 + $0x18] sm:$0xff] }
 0x2c6   : > { %v671_v63 = vadd.f32 %v2596_v53, %v602_v62  ;;  %v673_v1 = vadd.f32 %v2598_v54, %v602_v62 }
 0x2c7   : > { %2042 = vmatmul.mubr.msk.bf16.vlgmr.msra.gmra.mxu1 %vm795_vm8, %v2036_v56 }
 0x2c8   : > { %1092 = vmatpush1.bf16.msra.mxu1 %v1072_v57  ;;  %1109 = vmatprep.mubr.bf16.mxu1 %v2357_v0  ;;  %v683_v9 = vmax.f32 %v671_v63, 0.0  ;;  %v684_v11 = vmax.f32 %v673_v1, 0.0 }
 0x2c9   : > { %v959_v2 = vpop.permute.xlu0 %958  ;;  %v704_v3 = vpop.permute.xlu1 %703 }
 0x2ca   : > { %v715_v18 = vmul.f32 %v704_v3, %v683_v9  ;;  %v716_v19 = vmul.f32 %v704_v3, %v684_v11 }
 0x2cd   : > { %v968_v14 = vpop.permute.xlu0 %967  ;;  %v736_v16 = vpop.permute.xlu1 %735 }
 0x2ce   : > { %v747_v22 = vadd.f32 %v736_v16, %v715_v18  ;;  %v748_v23 = vadd.f32 %v736_v16, %v716_v19 }
 0x2cf   : > { %2057 = vmatmul.mubr.msk.bf16.vlgmr.msra.gmra.mxu1 %vm989_vm9, %v2270_v59 }
 0x2d0   : > { %1119 = vmatprep.mubr.bf16.mxu1 %v2357_v0 }
 0x2d7   : > { %2058 = vmatmul.mubr.msk.bf16.gmra.mxu1 %vm989_vm9, %v2272_v5 }
 0x2d8   : > { %1292 = vmatprep.mubr.bf16.mxu1 %v2357_v0 }
 0x387   : > { %v945_v4 = vpop.f32.mrf.mxu1 }
 0x388   : > { %v946_v6 = vadd.f32 %v945_v4, %v900_v61 }
 0x389   : > { %v947_v8 = vpop.f32.mrf.mxu1 }
 0x38a   : > { %v952_v12 = vmax.f32 %v946_v6, 0.0  ;;  %v948_v13 = vadd.f32 %v947_v8, %v900_v61 }
 0x38b   : > { %v949_v53 = vpop.f32.mrf.mxu1 }
 0x38c   : > { %v961_v54 = vmul.f32 %v959_v2, %v952_v12  ;;  %v953_v15 = vmax.f32 %v948_v13, 0.0 }
 0x38d   : > { %v950_v17 = vpop.f32.mrf.mxu1 }
 0x38e   : > { %v970_v20 = vadd.f32 %v968_v14, %v961_v54  ;;  %v962_v21 = vmul.f32 %v959_v2, %v953_v15 }
 0x390   : > { %v971_v24 = vadd.f32 %v968_v14, %v962_v21  ;;  %v977_v25 = vpack.c.bf16 %v970_v20, %v970_v20  ;;  %v2657_v26 = vadd.f32 %v970_v20, %v747_v22 }
 0x392   : > { %v978_v27 = vpack.c.bf16 %v971_v24, %v971_v24  ;;  %v2659_v28 = vadd.f32 %v971_v24, %v748_v23  ;;  %v997_v29 = vsel %vm799_vm4, %v977_v25, 0 }
 0x394   : > { %2051 = vmatprep.subr.msk.bf16.mxu0 %vm799_vm4, %v978_v27  ;;  %v2242_v30 = vpack.i.bf16 %v2659_v28, %v2657_v26 }
 0x395   : > { %1017 = vmatpush1.bf16.msra.mxu0 %v997_v29 }
 0x396   : > { %2243 = vrot.lane.b32.xlu0 %v2242_v30, %s3088_s25  ;;  %2238 = vrot.lane.b32.xlu1 %v2242_v30, %s3087_s24  ;;  %s2024_s25 = sshll.u32 %s566_s21, 5  ;;  %s2994_s24 = scalar_lea.sflag [#allocation3], %s566_s21 }
 0x397   : > { %s568_s19 = scalar_lea.vmem [#allocation2], %s2024_s25  ;;  %s2299_s25 = sshll.u32 %s2362_s1, 4  ;;  %s2300_s25 = int_to_ptr.vmem [resolvable:$false] %s2299_s25 }
 0x398   : > { %2052 = vmatmul.mubr.msk.bf16.vlgmr.msra.gmra.mxu0 %vm989_vm9, %v2269_v31  ;;  %s1958_s30 = sshll.u32 %s568_s19, 4  ;;  %s2301_s3 = scalar_lea.vmem %s2300_s25, 1024  ;;  %s2987_s30 = int_to_ptr.vmem [resolvable:$true] %s1958_s30 }
 0x399   : > { %1044 = vmatprep.mubr.bf16.mxu0 %v2357_v0  ;;  %s2295_s0 = scalar_lea.vmem %s2987_s30, 512  ;;  %p2302_p0 = scmp.lt.s32.totalorder %s2987_s30, %s2300_s25 }
 0x39a   : > { %1217 = vperm.xlu0 %2215, %v2066_v32   ;;  %1158 = vperm.xlu1 %2216, %v2060_v35   ;;  %p2296_p11 = scmp.ne.s32.totalorder %s2987_s30, %s2295_s0  ;;  %p2303_p1 = scmp.lt.s32.totalorder %s2301_s3, %s2295_s0 }
 0x39c   : > { %p2297_p12 = pnand %p2296_p11, %p2498_p5  ;;  %p2304_p2 = por %p2303_p1, %p2302_p0 }
 0x39e   : > { %1226 = vperm.xlu0 %2215, %v2067_v36   ;;  %606 = vperm.xlu1 %2216, %v588_v37   ;;  %p2298_p13 = pneg %p2297_p12 }
 0x3a0   : > { %2053 = vmatmul.mubr.msk.bf16.gmra.mxu0 %vm989_vm9, %v2271_v38  ;;  %p2305_p3 = pnand %p2304_p2, %p2298_p13 }
 0x3a1   : > { %1202 = vmatprep.mubr.bf16.mxu0 %v2357_v0 }
 0x3a2   : > { %740 = vperm.xlu0 %2215, %v722_v39   ;;  %708 = vperm.xlu1 %2216, %v690_v40  }
 0x3a6   : > { %1422 = vperm.xlu0 %2215, %v1412_v41   ;;  %1417 = vperm.xlu1 %2216, %v1411_v42  }
 0x3aa   : > { %1489 = vperm.xlu0 %2215, %v1483_v43   ;;  %1457 = vperm.xlu1 %2216, %v1451_v44  }
 0x3ae   : > { %1462 = vperm.xlu0 %2215, %v1452_v45   ;;  %1427 = vperm.xlu1 %2216, %v1413_v46  }
 0x3b2   : > { %1432 = vperm.xlu0 %2215, %v1414_v47   ;;  %1494 = vperm.xlu1 %2216, %v1484_v48  }
 0x3b6   : > { %1499 = vperm.xlu0 %2215, %v1485_v49   ;;  %1467 = vperm.xlu1 %2216, %v1453_v51  }
 0x3ba   : > { %1504 = vperm.xlu0 %2215, %v1486_v52   ;;  %1472 = vperm.xlu1 %2216, %v1454_v55   ;;  %v2273_v55 = vld [vmem:[%s3043_s9 + $0x20] sm:$0xff]  }
 0x408   : > { %v2244_v56 = vpop.permute.xlu0 %2243  ;;  %v2239_v57 = vpop.permute.xlu1 %2238 }
 0x409   : > { %v2246_v59 = vunpack.i.h.bf16 %v2244_v56  ;;  %v2245_v61 = vunpack.i.l.bf16 %v2244_v56  ;;  %v2241_v62 = vunpack.i.h.bf16 %v2239_v57  ;;  %v2240_v63 = vunpack.i.l.bf16 %v2239_v57  ;;  %v2275_v56 = vld [vmem:[%s3043_s9 + $0x28] sm:$0xff]   ;;  %v2277_v57 = vld [vmem:[%s3047_s13] sm:$0xff]  }
 0x40b   : > { %v1145_v1 = vsel %vm773_vm2, %v2241_v62, %v2240_v63  ;;  %v1144_v2 = vsel %vm773_vm2, %v2240_v63, %v2241_v62  ;;  %v1136_v5 = vsel %vm758_vm1, %v2245_v61, %v2246_v59  ;;  %v1137_v9 = vsel %vm758_vm1, %v2246_v59, %v2245_v61  ;;  %v1644_v59 = vld [vmem:[%s3048_s14 + $0x78] sm:$0xff]  ;;  %v1659_v61 = vld [vmem:[%s3048_s14 + $0xf0] sm:$0xff]  ;;  %v1658_v62 = vld [vmem:[%s3048_s14 + $0xe8] sm:$0xff] }
 0x40c   : > { %v1147_v3 = vsel %vm779_vm3, %v1145_v1, 0.0  ;;  %v1150_v4 = vpack.c.bf16 %v1144_v2, %v1144_v2  ;;  %v1149_v11 = vpack.c.bf16 %v2659_v28, %v1136_v5  ;;  %v2063_v12 = vpack.c.bf16 %v2657_v26, %v1137_v9  ;;  %v1642_v63 = vld [vmem:[%s3048_s14 + $0x68] sm:$0xff]  ;;  %v1657_v1 = vld [vmem:[%s3048_s14 + $0xe0] sm:$0xff]  ;;  %v1655_v5 = vld [vmem:[%s3048_s14 + $0xd0] sm:$0xff] }
 0x40d   : > { %v1151_v6 = vpack.c.bf16 %v1147_v3, %v1147_v3  ;;  %v1641_v2 = vld [vmem:[%s3048_s14 + $0x60] sm:$0xff]  ;;  %v1656_v3 = vld [vmem:[%s3048_s14 + $0xd8] sm:$0xff]  ;;  %v1638_v9 = vld [vmem:[%s3048_s14 + $0x48] sm:$0xff] }
 0x40e   : > { %v1165_v8 = vsel %vm799_vm4, %v1150_v4, 0  ;;  %v1640_v4 = vld [vmem:[%s3048_s14 + $0x58] sm:$0xff] }
 0x40f   : > { %2061 = vmatprep.subr.msk.bf16.mxu0 %vm799_vm4, %v1151_v6  ;;  %v1639_v6 = vld [vmem:[%s3048_s14 + $0x50] sm:$0xff] }
 0x410   : > { %1183 = vmatpush1.bf16.msra.mxu0 %v1165_v8  ;;  %v1654_v8 = vld [vmem:[%s3048_s14 + $0xc8] sm:$0xff] }
 0x411   : > { %1184 = vmatprep.subr.bf16.mxu0 %v1149_v11  ;;  %v1653_v11 = vld [vmem:[%s3048_s14 + $0xc0] sm:$0xff] }
 0x414   : > { %2064 = vmatpush1.bf16.msk.msra.mxu0 %vm2585_vm7, %v2063_v12  ;;  %v1637_v12 = vld [vmem:[%s3048_s14 + $0x40] sm:$0xff] }
 0x415   : > { %v1218_v13 = vpop.permute.xlu0 %1217  ;;  %v1159_v53 = vpop.permute.xlu1 %1158 }
 0x417   : > { %2065 = vmatmul.mubr.msk.bf16.vlgmr.msra.gmra.mxu0 %vm795_vm8, %v2059_v34  ;;  %v1652_v34 = vld [vmem:[%s3048_s14 + $0xb8] sm:$0xff] }
 0x418   : > { %1382 = vmatprep.mubr.bf16.mxu0 %v2357_v0 }
 0x419   : > { %v1227_v14 = vpop.permute.xlu0 %1226  ;;  %v607_v54 = vpop.permute.xlu1 %606 }
 0x41a   : > { %v675_v15 = vadd.f32 %v2600_v58, %v607_v54  ;;  %v677_v16 = vadd.f32 %v2602_v60, %v607_v54  ;;  %v2274_v58 = vld [vmem:[%s3043_s9 + $0x30] sm:$0xff]   ;;  %v2276_v60 = vld [vmem:[%s3043_s9 + $0x38] sm:$0xff]   ;;  %v1650_v54 = vld [vmem:[%s3048_s14 + $0xa8] sm:$0xff] }
 0x41c   : > { %v685_v17 = vmax.f32 %v675_v15, 0.0  ;;  %v686_v18 = vmax.f32 %v677_v16, 0.0  ;;  %v1634_v15 = vld [vmem:[%s3048_s14 + $0x28] sm:$0xff]  ;;  %v1649_v16 = vld [vmem:[%s3048_s14 + $0xa0] sm:$0xff] }
 0x41d   : > { %v709_v50 = vpop.permute.xlu1 %708  ;;  %v741_v21 = vpop.permute.xlu0 %740 }
 0x41e   : > { %v717_v19 = vmul.f32 %v709_v50, %v685_v17  ;;  %v718_v20 = vmul.f32 %v709_v50, %v686_v18  ;;  %v1633_v17 = vld [vmem:[%s3048_s14 + $0x20] sm:$0xff]  ;;  %v1648_v18 = vld [vmem:[%s3048_s14 + $0x98] sm:$0xff] }
 0x41f   : > { %v1632_v50 = vld [vmem:[%s3048_s14 + $0x18] sm:$0xff] }
 0x420   : > { %v749_v22 = vadd.f32 %v741_v21, %v717_v19  ;;  %v750_v23 = vadd.f32 %v741_v21, %v718_v20  ;;  %v1111_v19 = vpop.f32.mrf.mxu1 }
 0x422   : > { %v1326_v24 = vpack.c.bf16 %v749_v22, %v749_v22  ;;  %v1327_v25 = vpack.c.bf16 %v750_v23, %v750_v23  ;;  %v1113_v20 = vpop.f32.mrf.mxu1 }
 0x424   : > { %2083 = vmatprep.subr.msk.bf16.mxu0 %vm799_vm4, %v1327_v25  ;;  %v1345_v26 = vsel %vm799_vm4, %v1326_v24, 0  ;;  %v1115_v21 = vpop.f32.mrf.mxu1 }
 0x425   : > { %1365 = vmatpush1.bf16.msra.mxu0 %v1345_v26 }
 0x426   : > { %v1117_v22 = vpop.f32.mrf.mxu1 }
 0x428   : > { %2084 = vmatmul.mubr.msk.bf16.vlgmr.msra.gmra.mxu0 %vm989_vm9, %v2274_v58  ;;  %v1121_v23 = vpop.f32.mrf.mxu1  ;;  %v1418_v58 = vpop.permute.xlu1 %1417 }
 0x429   : > { %1392 = vmatprep.mubr.bf16.mxu0 %v2357_v0 }
 0x42a   : > { %v1123_v25 = vpop.f32.mrf.mxu1 }
 0x430   : > { %2085 = vmatmul.mubr.msk.bf16.gmra.mxu0 %vm989_vm9, %v2276_v60  ;;  %v1125_v60 = vpop.f32.mrf.mxu1 }
 0x458   : > { %v2765_v27 = vpop.f32.mrf.mxu0 }
 0x45a   : > { %v2767_v28 = vpop.f32.mrf.mxu0 }
 0x45c   : > { %v2769_v29 = vpop.f32.mrf.mxu0 }
 0x45e   : > { %v2771_v30 = vpop.f32.mrf.mxu0 }
 0x460   : > { %v2773_v31 = vpop.f32.mrf.mxu0 }
 0x462   : > { %v2775_v32 = vpop.f32.mrf.mxu0 }
 0x464   : > { %v2777_v35 = vpop.f32.mrf.mxu0 }
 0x466   : > { %v2779_v36 = vpop.f32.mrf.mxu0 }
 0x4d7   : > { %v1204_v37 = vpop.f32.mrf.mxu0 }
 0x4d8   : > { %v1205_v38 = vadd.f32 %v1204_v37, %v1159_v53 }
 0x4d9   : > { %v1206_v39 = vpop.f32.mrf.mxu0 }
 0x4da   : > { %v1211_v40 = vmax.f32 %v1205_v38, 0.0  ;;  %v1207_v41 = vadd.f32 %v1206_v39, %v1159_v53  ;;  %v1651_v53 = vld [vmem:[%s3048_s14 + $0xb0] sm:$0xff]  ;;  %v1423_v38 = vpop.permute.xlu0 %1422  ;;  %v1127_v39 = vpop.f32.mrf.mxu1 }
 0x4db   : > { %v1208_v42 = vpop.f32.mrf.mxu0 }
 0x4dc   : > { %v1220_v43 = vmul.f32 %v1218_v13, %v1211_v40  ;;  %v1212_v44 = vmax.f32 %v1207_v41, 0.0  ;;  %v1458_v40 = vpop.permute.xlu1 %1457  ;;  %v1112_v41 = vadd.f32 %v1111_v19, %v2765_v27 }
 0x4dd   : > { %v1209_v45 = vpop.f32.mrf.mxu0 }
 0x4de   : > { %v1229_v46 = vadd.f32 %v1227_v14, %v1220_v43  ;;  %v1221_v47 = vmul.f32 %v1218_v13, %v1212_v44  ;;  %v1636_v13 = vld [vmem:[%s3048_s14 + $0x38] sm:$0xff]  ;;  %v1114_v44 = vadd.f32 %v1113_v20, %v2767_v28 }
 0x4e0   : > { %v1230_v48 = vadd.f32 %v1227_v14, %v1221_v47  ;;  %v1236_v49 = vpack.c.bf16 %v1229_v46, %v1229_v46  ;;  %v1635_v14 = vld [vmem:[%s3048_s14 + $0x30] sm:$0xff]  ;;  %v2884_v47 = vpop.permute.xlu0 %1489 }
 0x4e2   : > { %v1237_v51 = vpack.c.bf16 %v1230_v48, %v1230_v48  ;;  %v1255_v52 = vsel %vm799_vm4, %v1236_v49, 0  ;;  %v1116_v48 = vadd.f32 %v1115_v21, %v2769_v29  ;;  %v1630_v21 = vld [vmem:[%s3048_s14 + $0x8] sm:$0xff] }
 0x4e4   : > { %2074 = vmatprep.subr.msk.bf16.mxu1 %vm799_vm4, %v1237_v51 }
 0x4e5   : > { %1275 = vmatpush1.bf16.msra.mxu1 %v1255_v52 }
 0x4e6   : > { %1549 = vmatprep.subr.bf16.mxu1 %v2526_v7  ;;  %v2278_v7 = vld [vmem:[%s3047_s13 + $0x8] sm:$0xff]  }
 0x4e8   : > { %2075 = vmatmul.mubr.msk.bf16.vlgmr.msra.gmra.mxu1 %vm989_vm9, %v2273_v55  ;;  %v1384_v24 = vpop.f32.mrf.mxu0 }
 0x4e9   : > { %1302 = vmatprep.mubr.bf16.mxu1 %v2357_v0  ;;  %1550 = vmatpush1.bf16.msra.mxu1 %v2531_v10  ;;  %v1660_v10 = vld [vmem:[%s3048_s14 + $0xf8] sm:$0xff] }
 0x4ea   : > { %2101 = vmatprep.subr.mxu0 %v1660_v10  ;;  %v1386_v26 = vpop.f32.mrf.mxu0 }
 0x4eb   : > { %2102 = vmatpush3.msra.mxu0 %v1644_v59 }
 0x4ec   : > { %2103 = vmatprep.subr.mxu0 %v1659_v61  ;;  %v1388_v37 = vpop.f32.mrf.mxu0  ;;  %v1122_v61 = vadd.f32 %v1121_v23, %v2773_v31  ;;  %v1126_v31 = vadd.f32 %v1125_v60, %v2777_v35  ;;  %v1646_v35 = vld [vmem:[%s3048_s14 + $0x88] sm:$0xff]  ;;  %v1629_v23 = vld [vmem:[%s3048_s14] sm:$0xff] }
 0x4ee   : > { %v1390_v43 = vpop.f32.mrf.mxu0 }
 0x4f0   : > { %2076 = vmatmul.mubr.msk.bf16.gmra.mxu1 %vm989_vm9, %v2275_v56  ;;  %v1394_v55 = vpop.f32.mrf.mxu0  ;;  %v1428_v56 = vpop.permute.xlu1 %1427 }
 0x4f1   : > { %1567 = vmatprep.mubr.bf16.mxu1 %v2357_v0 }
 0x4f8   : > { %2088 = vmatmul.mubr.msk.bf16.vlgmr.msra.gmra.mxu1 %vm619_vm0, %v2277_v57  ;;  %v1118_v57 = vadd.f32 %v1117_v22, %v2771_v30  ;;  %v1645_v22 = vld [vmem:[%s3048_s14 + $0x80] sm:$0xff] }
 0x4f9   : > { %1577 = vmatprep.mubr.bf16.mxu1 %v2357_v0  ;;  %v1643_v0 = vld [vmem:[%s3048_s14 + $0x70] sm:$0xff] }
 0x4fa   : > { %2104 = vmatpush3.msra.mxu0 %v1643_v0 }
 0x4fb   : > { %2105 = vmatprep.subr.mxu0 %v1658_v62 }
 0x4fc   : > { %2106 = vmatpush3.msra.mxu0 %v1642_v63  ;;  %v1124_v63 = vadd.f32 %v1123_v25, %v2775_v32  ;;  %v1631_v32 = vld [vmem:[%s3048_s14 + $0x10] sm:$0xff] }
 0x4fd   : > { %2107 = vmatprep.subr.mxu0 %v1657_v1 }
 0x4fe   : > { %2108 = vmatpush3.msra.mxu0 %v1641_v2  ;;  %v1396_v2 = vpop.f32.mrf.mxu0 }
 0x4ff   : > { %2109 = vmatprep.subr.mxu0 %v1656_v3  ;;  %v1463_v3 = vpop.permute.xlu0 %1462 }
 0x500   : > { %2089 = vmatmul.mubr.msk.bf16.gmra.mxu1 %vm619_vm0, %v2278_v7  ;;  %2110 = vmatpush3.msra.mxu0 %v1640_v4 }
 0x501   : > { %2111 = vmatprep.subr.mxu0 %v1655_v5 }
 0x502   : > { %2112 = vmatpush3.msra.mxu0 %v1639_v6 }
 0x503   : > { %2113 = vmatprep.subr.mxu0 %v1654_v8 }
 0x504   : > { %2114 = vmatpush3.msra.mxu0 %v1638_v9  ;;  %v1647_v9 = vld [vmem:[%s3048_s14 + $0x90] sm:$0xff] }
 0x505   : > { %2115 = vmatprep.subr.mxu0 %v1653_v11  ;;  %v1495_v11 = vpop.permute.xlu1 %1494 }
 0x506   : > { %2116 = vmatpush3.msra.mxu0 %v1637_v12 }
 0x507   : > { %2117 = vmatprep.subr.mxu0 %v1652_v34 }
 0x508   : > { %2118 = vmatpush3.msra.mxu0 %v1636_v13 }
 0x509   : > { %2119 = vmatprep.subr.mxu0 %v1651_v53  ;;  %v1128_v53 = vadd.f32 %v1127_v39, %v2779_v36 }
 0x50a   : > { %2120 = vmatpush3.msra.mxu0 %v1635_v14 }
 0x50b   : > { %2121 = vmatprep.subr.mxu0 %v1650_v54 }
 0x50c   : > { %2122 = vmatpush3.msra.mxu0 %v1634_v15  ;;  %v1398_v15 = vpop.f32.mrf.mxu0 }
 0x50d   : > { %2123 = vmatprep.subr.mxu0 %v1649_v16 }
 0x50e   : > { %2124 = vmatpush3.msra.mxu0 %v1633_v17 }
 0x50f   : > { %2125 = vmatprep.subr.mxu0 %v1648_v18 }
 0x510   : > { %2126 = vmatpush3.msra.mxu0 %v1632_v50 }
 0x511   : > { %2127 = vmatprep.subr.mxu0 %v1647_v9 }
 0x512   : > { %2128 = vmatpush3.msra.mxu0 %v1631_v32 }
 0x513   : > { %2129 = vmatprep.subr.mxu0 %v1646_v35 }
 0x514   : > { %2130 = vmatpush3.msra.mxu0 %v1630_v21 }
 0x515   : > { %2131 = vmatprep.subr.mxu0 %v1645_v22 }
 0x516   : > { %2132 = vmatpush3.msra.mxu0 %v1629_v23 }
 0x5a8   : > { %v1294_v42 = vpop.f32.mrf.mxu1 }
 0x5a9   : > { %v1313_v45 = vadd.f32 %v1294_v42, %v1112_v41 }
 0x5aa   : > { %v1296_v46 = vpop.f32.mrf.mxu1 }
 0x5ab   : > { %v1314_v49 = vadd.f32 %v1296_v46, %v1114_v44  ;;  %v1403_v51 = vadd.f32 %v1384_v24, %v1313_v45  ;;  %v1433_v24 = vpop.permute.xlu0 %1432  ;;  %v1468_v46 = vpop.permute.xlu1 %1467 }
 0x5ac   : > { %v1298_v52 = vpop.f32.mrf.mxu1 }
 0x5ad   : > { %v1435_v7 = vadd.f32 %v1418_v58, %v1403_v51  ;;  %v1315_v10 = vadd.f32 %v1298_v52, %v1116_v48  ;;  %v1404_v27 = vadd.f32 %v1386_v26, %v1314_v49 }
 0x5ae   : > { %v1300_v59 = vpop.f32.mrf.mxu1 }
 0x5af   : > { %v1436_v28 = vadd.f32 %v1418_v58, %v1404_v27  ;;  %v1316_v0 = vadd.f32 %v1300_v59, %v1118_v57  ;;  %v1405_v62 = vadd.f32 %v1388_v37, %v1315_v10  ;;  %v1443_v1 = vmax.f32 %v1435_v7, 0.0  ;;  %v1400_v37 = vpop.f32.mrf.mxu0 }
 0x5b0   : > { %v1304_v29 = vpop.f32.mrf.mxu1 }
 0x5b1   : > { %v1444_v4 = vmax.f32 %v1436_v28, 0.0  ;;  %v1437_v5 = vadd.f32 %v1423_v38, %v1405_v62  ;;  %v1317_v6 = vadd.f32 %v1304_v29, %v1122_v61  ;;  %v1406_v8 = vadd.f32 %v1390_v43, %v1316_v0  ;;  %v1500_v28 = vpop.permute.xlu0 %1499 }
 0x5b2   : > { %v1306_v30 = vpop.f32.mrf.mxu1  ;;  %v1475_v16 = vmul.f32 %v1458_v40, %v1443_v1 }
 0x5b3   : > { %v1438_v12 = vadd.f32 %v1423_v38, %v1406_v8  ;;  %v1318_v34 = vadd.f32 %v1306_v30, %v1124_v63  ;;  %v1407_v13 = vadd.f32 %v1394_v55, %v1317_v6  ;;  %v1445_v14 = vmax.f32 %v1437_v5, 0.0 }
 0x5b4   : > { %v1308_v54 = vpop.f32.mrf.mxu1  ;;  %v1476_v17 = vmul.f32 %v1458_v40, %v1444_v4  ;;  %v1507_v38 = vadd.f32 %v2884_v47, %v1475_v16 }
 0x5b5   : > { %v1446_v18 = vmax.f32 %v1438_v12, 0.0  ;;  %v1439_v50 = vadd.f32 %v1428_v56, %v1407_v13  ;;  %v1319_v19 = vadd.f32 %v1308_v54, %v1126_v31  ;;  %v1408_v20 = vadd.f32 %v1396_v2, %v1318_v34  ;;  %v1505_v9 = vpop.permute.xlu0 %1504 }
 0x5b6   : > { %v1310_v36 = vpop.f32.mrf.mxu1  ;;  %v1477_v40 = vmul.f32 %v1463_v3, %v1445_v14  ;;  %v1508_v45 = vadd.f32 %v2884_v47, %v1476_v17  ;;  %v1473_v47 = vpop.permute.xlu1 %1472 }
 0x5b7   : > { %v1440_v25 = vadd.f32 %v1428_v56, %v1408_v20  ;;  %v1320_v26 = vadd.f32 %v1310_v36, %v1128_v53  ;;  %v1409_v58 = vadd.f32 %v1398_v15, %v1319_v19  ;;  %v1447_v60 = vmax.f32 %v1439_v50, 0.0 }
 0x5b8   : > { %v1569_v39 = vpop.f32.mrf.mxu1  ;;  %v1478_v41 = vmul.f32 %v1463_v3, %v1446_v18  ;;  %v1509_v55 = vadd.f32 %v1495_v11, %v1477_v40 }
 0x5b9   : > { %v1448_v42 = vmax.f32 %v1440_v25, 0.0  ;;  %v1441_v43 = vadd.f32 %v1433_v24, %v1409_v58  ;;  %v1410_v44 = vadd.f32 %v1400_v37, %v1320_v26  ;;  %v1588_v51 = vadd.f32 %v1569_v39, %v1507_v38 }
 0x5ba   : > { %v1571_v48 = vpop.f32.mrf.mxu1  ;;  %v1510_v57 = vadd.f32 %v1495_v11, %v1478_v41  ;;  %v1479_v7 = vmul.f32 %v1468_v46, %v1447_v60 }
 0x5bb   : > { %v1442_v49 = vadd.f32 %v1433_v24, %v1410_v44  ;;  %v1589_v52 = vadd.f32 %v1571_v48, %v1508_v45  ;;  %v1449_v10 = vmax.f32 %v1441_v43, 0.0  ;;  %v1480_v61 = vmul.f32 %v1468_v46, %v1448_v42 }
 0x5bc   : > { %v1573_v56 = vpop.f32.mrf.mxu1  ;;  %v1511_v1 = vadd.f32 %v1500_v28, %v1479_v7 }
 0x5bd   : > { %v1450_v27 = vmax.f32 %v1442_v49, 0.0  ;;  %v2247_v59 = vpack.i.bf16 %v1589_v52, %v1588_v51  ;;  %v1590_v62 = vadd.f32 %v1573_v56, %v1509_v55  ;;  %v1512_v3 = vadd.f32 %v1500_v28, %v1480_v61  ;;  %v1889_v61 = vld [vmem:[%s3049_s15 + $0x8] sm:$0xff]  ;;  %v1888_v28 = vld [vmem:[%s3049_s15] sm:$0xff] }
 0x5be   : > { %v1575_v0 = vpop.f32.mrf.mxu1  ;;  %v1481_v4 = vmul.f32 %v1473_v47, %v1449_v10 }
 0x5bf   : > { %v1591_v63 = vadd.f32 %v1575_v0, %v1510_v57  ;;  %2248 = vrot.lane.b32.xlu1 %v2247_v59, %s2361_s23  ;;  %v1482_v5 = vmul.f32 %v1473_v47, %v1450_v27  ;;  %v1758_v0 = vld [vmem:[%s3050_s16] sm:$0xff] }
 0x5c0   : > { %v1579_v29 = vpop.f32.mrf.mxu1  ;;  %v1513_v12 = vadd.f32 %v1505_v9, %v1481_v4  ;;  %2161 = vmatprep.mubr.msk.f32.mxu1 %vm1766_vm11, %v1758_v0 }
 0x5c1   : > { %v2252_v2 = vpack.i.bf16 %v1591_v63, %v1590_v62  ;;  %v1592_v8 = vadd.f32 %v1579_v29, %v1511_v1  ;;  %v1514_v34 = vadd.f32 %v1505_v9, %v1482_v5  ;;  %v1761_v9 = vld [vmem:[%s3050_s16 + $0x18] sm:$0xff] }
 0x5c2   : > { %v1581_v6 = vpop.f32.mrf.mxu1 }
 0x5c3   : > { %v1593_v30 = vadd.f32 %v1581_v6, %v1512_v3  ;;  %2253 = vrot.lane.b32.xlu0 %v2252_v2, %s2361_s23 }
 0x5c4   : > { %v1583_v11 = vpop.f32.mrf.mxu1 }
 0x5c5   : > { %v2257_v31 = vpack.i.bf16 %v1593_v30, %v1592_v8  ;;  %v1594_v32 = vadd.f32 %v1583_v11, %v1513_v12  ;;  %v1763_v11 = vld [vmem:[%s3051_s17 + $0x8] sm:$0xff]  ;;  %v1762_v12 = vld [vmem:[%s3051_s17] sm:$0xff] }
 0x5c6   : > { %v1585_v13 = vpop.f32.mrf.mxu1 }
 0x5c7   : > { %v1595_v53 = vadd.f32 %v1585_v13, %v1514_v34  ;;  %2258 = vrot.lane.b32.xlu1 %v2257_v31, %s2361_s23 }
 0x5c9   : > { %v2262_v14 = vpack.i.bf16 %v1595_v53, %v1594_v32 }
 0x5cb   : > { %2263 = vrot.lane.b32.xlu0 %v2262_v14, %s2361_s23  ;;  %s2992_s23 = scalar_lea.hbm %s3089_s22, %s2100_s20 }
 0x631   : > { %v2249_v54 = vpop.permute.xlu1 %2248 }
 0x632   : > { %v2251_v15 = vunpack.i.h.bf16 %v2249_v54  ;;  %v2250_v16 = vunpack.i.l.bf16 %v2249_v54 }
 0x634   : > { %v1613_v17 = vsel %vm1612_vm10, %v2250_v16, %v2251_v15  ;;  %v1617_v35 = vsel %vm1612_vm10, %v2251_v15, %v2250_v16  ;;  %v1764_v15 = vld [vmem:[%s3051_s17 + $0x10] sm:$0xff] }
 0x635   : > { %v1621_v18 = vmax.f32 %v1588_v51, %v1613_v17  ;;  %v2254_v50 = vpop.permute.xlu0 %2253  ;;  %v1622_v19 = vmax.f32 %v1589_v52, %v1617_v35 }
 0x636   : > { %v2256_v20 = vunpack.i.h.bf16 %v2254_v50  ;;  %v2255_v21 = vunpack.i.l.bf16 %v2254_v50 }
 0x637   : > { %1725 = vmatprep.mubr.f32.mxu0 %v1622_v19 }
 0x638   : > { %1726 = vmatmul.mubr.f32.vlgmr.msra.gmra.mxu0 %v1621_v18  ;;  %v1618_v36 = vsel %vm1612_vm10, %v2256_v20, %v2255_v21  ;;  %v1614_v22 = vsel %vm1612_vm10, %v2255_v21, %v2256_v20 }
 0x639   : > { %v2259_v23 = vpop.permute.xlu1 %2258  ;;  %v1624_v24 = vmax.f32 %v1591_v63, %v1618_v36  ;;  %v1623_v25 = vmax.f32 %v1590_v62, %v1614_v22  ;;  %v1890_v62 = vld [vmem:[%s3049_s15 + $0x10] sm:$0xff]  ;;  %v1891_v63 = vld [vmem:[%s3049_s15 + $0x18] sm:$0xff] }
 0x63a   : > { %v2261_v26 = vunpack.i.h.bf16 %v2259_v23  ;;  %v2260_v58 = vunpack.i.l.bf16 %v2259_v23 }
 0x63b   : > { %1730 = vmatprep.mubr.f32.mxu0 %v1624_v24 }
 0x63c   : > { %1731 = vmatmul.mubr.f32.gmra.mxu0 %v1623_v25  ;;  %v1619_v60 = vsel %vm1612_vm10, %v2261_v26, %v2260_v58  ;;  %v1615_v37 = vsel %vm1612_vm10, %v2260_v58, %v2261_v26 }
 0x63d   : > { %v2264_v38 = vpop.permute.xlu0 %2263  ;;  %v1626_v39 = vmax.f32 %v1593_v30, %v1619_v60  ;;  %v1625_v40 = vmax.f32 %v1592_v8, %v1615_v37  ;;  %v1759_v8 = vld [vmem:[%s3050_s16 + $0x8] sm:$0xff]  ;;  %v1760_v30 = vld [vmem:[%s3050_s16 + $0x10] sm:$0xff] }
 0x63e   : > { %v2266_v41 = vunpack.i.h.bf16 %v2264_v38  ;;  %v2265_v42 = vunpack.i.l.bf16 %v2264_v38 }
 0x63f   : > { %1735 = vmatprep.mubr.f32.mxu0 %v1626_v39 }
 0x640   : > { %1736 = vmatmul.mubr.f32.gmra.mxu0 %v1625_v40  ;;  %v1620_v43 = vsel %vm1612_vm10, %v2266_v41, %v2265_v42  ;;  %v1616_v44 = vsel %vm1612_vm10, %v2265_v42, %v2266_v41 }
 0x641   : > { %v1628_v45 = vmax.f32 %v1595_v53, %v1620_v43  ;;  %v1627_v46 = vmax.f32 %v1594_v32, %v1616_v44  ;;  %v1765_v32 = vld [vmem:[%s3051_s17 + $0x18] sm:$0xff] }
 0x643   : > { %1740 = vmatprep.mubr.f32.mxu0 %v1628_v45 }
 0x644   : > { %1741 = vmatmul.mubr.f32.gmra.mxu0 %v1627_v46 }
 0x6f8   : > { %v2133_v48 = vpop.f32.mrf.mxu0 }
 0x6fa   : > { %v2134_v49 = vpop.f32.mrf.mxu0 }
 0x6fb   : > { %v2938_v59 = vadd.f32 %v2134_v49, %v2133_v48 }
 0x6fc   : > { %v2136_v51 = vpop.f32.mrf.mxu0 }
 0x6fe   : > { %v2137_v52 = vpop.f32.mrf.mxu0 }
 0x6ff   : > { %v2932_v27 = vadd.f32 %v2137_v52, %v2136_v51 }
 0x700   : > { %v2139_v55 = vpop.f32.mrf.mxu0 }
 0x702   : > { %v2140_v56 = vpop.f32.mrf.mxu0 }
 0x703   : > { %v2929_v57 = vadd.f32 %v2140_v56, %v2139_v55 }
 0x704   : > { %v2142_v7 = vpop.f32.mrf.mxu0 }
 0x705   : > { %1750 = vadd.xlane.f32.xlu0 %v2929_v57 }
 0x706   : > { %v2143_v10 = vpop.f32.mrf.mxu0 }
 0x707   : > { %v2934_v33 = vadd.f32 %v2143_v10, %v2142_v7 }
 0x709   : > { %1752 = vadd.xlane.f32.xlu1 %v2934_v33  ;;  %1748 = vadd.xlane.f32.xlu0 %v2932_v27 }
 0x70d   : > { %1746 = vadd.xlane.f32.xlu1 %v2938_v59 }
 0x71e   : > { %1899 = vperm.xlu1 %2216, %v1889_v61  }
 0x71f   : > { %1894 = vperm.xlu0 %2215, %v1888_v28  }
 0x722   : > { %1904 = vperm.xlu1 %2216, %v1890_v62  }
 0x723   : > { %1909 = vperm.xlu0 %2215, %v1891_v63  }
 0x78e   : > { %v1751_v47 = vpop.xlane.xlu0 %1750 }
 0x78f   : > { %v1756_v3 = vmul.f32 0.0078125, %v1751_v47 }
 0x792   : > { %v1753_v1 = vpop.xlane.xlu1 %1752  ;;  %v1749_v2 = vpop.xlane.xlu0 %1748 }
 0x793   : > { %v1757_v29 = vmul.f32 0.0078125, %v1753_v1  ;;  %v1755_v5 = vmul.f32 0.0078125, %v1749_v2 }
 0x795   : > { %2153 = vmatprep.subr.mxu1 %v1757_v29 }
 0x796   : > { %2154 = vmatpush3.msra.mxu1 %v1757_v29  ;;  %v1747_v4 = vpop.xlane.xlu1 %1746 }
 0x797   : > { %2155 = vmatprep.subr.mxu1 %v1756_v3  ;;  %v1754_v6 = vmul.f32 0.0078125, %v1747_v4 }
 0x798   : > { %2156 = vmatpush3.msra.mxu1 %v1756_v3 }
 0x799   : > { %2157 = vmatprep.subr.mxu1 %v1755_v5 }
 0x79a   : > { %2158 = vmatpush3.msra.mxu1 %v1755_v5  ;;  %v1895_v43 = vpop.permute.xlu0 %1894  ;;  %v1900_v44 = vpop.permute.xlu1 %1899 }
 0x79b   : > { %2159 = vmatprep.subr.mxu1 %v1754_v6  ;;  %v1913_v48 = vadd.f32 %v2932_v27, %v1900_v44  ;;  %v1912_v51 = vadd.f32 %v2938_v59, %v1895_v43 }
 0x79c   : > { %2160 = vmatpush3.msra.mxu1 %v1754_v6 }
 0x79d   : > { %2162 = vmatmul.mubr.msk.f32.vlgmr.msra.gmra.mxu1 %vm1766_vm11, %v1759_v8 }
 0x79e   : > { %2164 = vmatprep.mubr.msk.f32.mxu1 %vm1766_vm11, %v1760_v30  ;;  %v1910_v45 = vpop.permute.xlu0 %1909  ;;  %v1905_v46 = vpop.permute.xlu1 %1904 }
 0x79f   : > { %v1915_v56 = vadd.f32 %v2934_v33, %v1910_v45  ;;  %v1914_v61 = vadd.f32 %v2929_v57, %v1905_v46 }
 0x7a1   : > { %2165 = vmatmul.mubr.msk.f32.gmra.mxu1 %vm1766_vm11, %v1761_v9 }
 0x85d   : > { %v2163_v31 = vpop.f32.mrf.mxu1 }
 0x85e   : > { %v1851_v34 = vadd.f32 %v2163_v31, %v1763_v11 }
 0x85f   : > { %v1845_v13 = vpop.f32.mrf.mxu1 }
 0x860   : > { %v1865_v53 = vsub.f32 0.0, %v1851_v34  ;;  %v1846_v14 = vadd.f32 %v1845_v13, %v1762_v12 }
 0x861   : > { %v2166_v54 = vpop.f32.mrf.mxu1 }
 0x862   : > { %v1870_v16 = vmul.f32 1.442695, %v1865_v53  ;;  %v1864_v17 = vsub.f32 0.0, %v1846_v14  ;;  %v1861_v35 = vadd.f32 %v2166_v54, %v1765_v32 }
 0x863   : > { %v1855_v18 = vpop.f32.mrf.mxu1 }
 0x864   : > { %2279 = vpow2.f32 %v1870_v16  ;;  %v1868_v50 = vmul.f32 1.442695, %v1864_v17  ;;  %v1867_v19 = vsub.f32 0.0, %v1861_v35  ;;  %v1856_v20 = vadd.f32 %v1855_v18, %v1764_v15 }
 0x866   : > { %2281 = vpow2.f32 %v1868_v50  ;;  %v1874_v21 = vmul.f32 1.442695, %v1867_v19  ;;  %v1866_v36 = vsub.f32 0.0, %v1856_v20 }
 0x868   : > { %2283 = vpow2.f32 %v1874_v21  ;;  %v1872_v22 = vmul.f32 1.442695, %v1866_v36 }
 0x86a   : > { %2285 = vpow2.f32 %v1872_v22 }
 0x871   : > { %v2280_v23 = vpop.eup %2279 }
 0x872   : > { %v1877_v24 = vadd.f32 1.0, %v2280_v23 }
 0x873   : > { %v2282_v25 = vpop.eup %2281 }
 0x874   : > { %2287 = vrcp.f32 %v1877_v24  ;;  %v1876_v26 = vadd.f32 1.0, %v2282_v25 }
 0x875   : > { %v2284_v58 = vpop.eup %2283 }
 0x876   : > { %2289 = vrcp.f32 %v1876_v26  ;;  %v1879_v60 = vadd.f32 1.0, %v2284_v58 }
 0x877   : > { %v2286_v37 = vpop.eup %2285 }
 0x878   : > { %2291 = vrcp.f32 %v1879_v60  ;;  %v1878_v38 = vadd.f32 1.0, %v2286_v37 }
 0x87a   : > { %2293 = vrcp.f32 %v1878_v38 }
 0x881   : > { %v2288_v39 = vpop.eup %2287 }
 0x882   : > { %1923 = vperm.xlu0 %2215, %v2288_v39  }
 0x883   : > { %v2290_v40 = vpop.eup %2289 }
 0x884   : > { %1918 = vperm.xlu1 %2216, %v2290_v40  }
 0x885   : > { %v2292_v41 = vpop.eup %2291 }
 0x886   : > { %1933 = vperm.xlu0 %2215, %v2292_v41  }
 0x887   : > { %v2294_v42 = vpop.eup %2293 }
 0x888   : > { %1928 = vperm.xlu1 %2216, %v2294_v42  }
 0x8fd   : > { %v1924_v49 = vpop.permute.xlu0 %1923 }
 0x8fe   : > { %v1937_v52 = vmul.f32 %v1924_v49, %v1913_v48 }
 0x8ff   : > { %v1919_v55 = vpop.permute.xlu1 %1918 }
 0x900   : > { %1941 = vst [vmem:[%s568_s19 + $0x8] sm:$0xff] %v1937_v52  ;;  %v1936_v7 = vmul.f32 %v1919_v55, %v1912_v51 }
 0x901   : > { %v1934_v10 = vpop.permute.xlu0 %1933 }
 0x902   : > { %1940 = vst [vmem:[%s568_s19] sm:$0xff] %v1936_v7  ;;  %v1939_v28 = vmul.f32 %v1934_v10, %v1915_v56 }
 0x903   : > { %v1929_v27 = vpop.permute.xlu1 %1928 }
 0x904   : > { %1943 = vst [vmem:[%s568_s19 + $0x18] sm:$0xff] %v1939_v28  ;;  %v1938_v59 = vmul.f32 %v1929_v27, %v1914_v61 }
 0x906   : > { %1942 = vst [vmem:[%s568_s19 + $0x10] sm:$0xff] %v1938_v59 }
 0x907   : > { %2308 = shalt.err (!%p2305_p3)
}
 0x908   : > { %s2309_s21 = scalar_lea.hbm %s2992_s23, 512  ;;  %s2313_s27 = scalar_lea.hbm %s3089_s22, 1024 }
 0x909   : > { %p2310_p4 = scmp.ne.s32.totalorder %s2992_s23, %s2309_s21  ;;  %p2314_p9 = scmp.lt.s32.totalorder %s2992_s23, %s3089_s22 }
 0x90a   : > { %p2315_p10 = scmp.lt.s32.totalorder %s2313_s27, %s2309_s21 }
 0x90b   : > { %p2311_p7 = pnand %p2310_p4, %p2498_p5 }
 0x90c   : > { %p2316_p11 = por %p2315_p10, %p2314_p9 }
 0x90d   : > { %p2312_p8 = pneg %p2311_p7 }
 0x90f   : > { %p2317_p12 = pnand %p2316_p11, %p2312_p8 }
 0x911   : > { %2320 = shalt.err (!%p2317_p12)
}
 0x912   : > { %s2363_s3 = smov 128   ;;  %s2364_s0 = smov 8  }
 0x913   : > { %2169 = dma.vmem_to_hbm [thread:$0]  (%p2498_p5), %s2987_s30, 512, %s2992_s23, %s2994_s24, %s2363_s3, %s2363_s3, %s2364_s0  }
 0x914 PF: > { %s3090_s25 = sld [smem:[#allocation7_spill]] }
 0x915   : > { %s3091_s19 = sld [smem:[#allocation5_spill]] }
 0x91a   : > { %p2175_p13 = scmp.ge.s32.totalorder %s3090_s25, 2 }
 0x91b   : > { %s1973_s4 = sand.u32 1, %s3091_s19  }
 0x91c   : > { %p2172_p0 = pnand %p2175_p13, %p2502_p6  ;;  %s1974_s21 = scalar_lea.sflag [#allocation3], %s1973_s4 }
 0x91e   : > { %p2173_p1 = pneg %p2172_p0 }
 0x920   : > { %2338 = dma.done.wait (%p2173_p1), %s1974_s21, 512  }
 0x921   : > { %2340 = vsyncadd (%p2173_p1), %s1974_s21, 4294966784  ;;  %s3093_s30 = sld [smem:[#allocation8_spill]]  ;;  %s3096_s27 = smov %s2347_s28 }
 0x922   : > { %s3094_s29 = sld [smem:[#allocation6_spill]] }
 0x923   : > { %s3095_s1 = sld [smem:[#allocation9_spill]] }
 0x927   : > { %p28_p2 = scmp.ge.s32.totalorder %s3093_s30, 4  }
 0x928   : > { %s3097_s28 = smov %s3094_s29 }
 0x929   : > { %s3098_s29 = smov %s3095_s1  ;;  %30 = sbr.rel (!%p28_p2) target bundleno = 10 (0xa), region = 138 }
 0x92e   :  { %1979 = vsyncpa [#allocation3], 1 }
 0x92f   :  { %1981 = vsyncpa [#allocation3 + $0x1], 1 }

</bundles_post_ra>
